<compile_context>
chip_gen: v5e
topology: v5e:2x2
jax: 0.10.0
libtpu: 0.0.40
codegen_flags: <defaults>
</compile_context>

<pallas_src>
import functools

import jax
import jax.numpy as jnp
from jax import lax
from jax.experimental import pallas as pl
from jax.experimental.pallas import tpu as pltpu


def _rmsnorm(x, gamma, eps=1e-6):
    var = jnp.mean(x * x, axis=-1, keepdims=True)
    return x * lax.rsqrt(var + eps) * gamma


def transformer_block_kernel(
    # inputs
    x_ref, g1_ref, g2_ref, wq_ref, wk_ref, wv_ref, wo_ref, wr_ref,
    w1_ref, w2_ref,
    # outputs
    o_ref,
    # scratch (persists across the expert grid axis)
    h2_scr, gates_scr, acc_scr,
    *, num_heads, window_size, n_experts_per_token, num_experts,
    q_tile, kv_len,
):
    H = x_ref.shape[2]
    dh = H // num_heads
    E = num_experts
    tq, Lk = q_tile, kv_len
    neg = jnp.float32(-1e30)
    scale = jnp.float32(1.0 / (dh ** 0.5))
    bf16 = jnp.bfloat16

    # ---- all grid-position reads hoisted to top level (NOT inside pl.when) --
    qi = pl.program_id(1)
    e_idx = pl.program_id(2)
    q0 = qi * tq                               # query-tile start (element idx)
    k0 = jnp.maximum(q0 + tq - Lk, 0)          # K/V slab start covering window

    # --------- attention + router: once per (batch, query-tile), at e == 0 ----
    @pl.when(e_idx == 0)
    def _attention_and_router():
        xq = x_ref[0, pl.ds(q0, tq), :]        # (tq, H) f32 query rows
        xk = x_ref[0, pl.ds(k0, Lk), :]        # (Lk, H) f32 key/value rows

        g1 = g1_ref[...]
        hq = _rmsnorm(xq, g1).astype(bf16)
        hk = _rmsnorm(xk, g1).astype(bf16)

        # rotation matrix is pre-folded into wq/wk on the host
        q = jnp.dot(hq, wq_ref[...], preferred_element_type=jnp.float32)
        k = jnp.dot(hk, wk_ref[...], preferred_element_type=jnp.float32)
        v = jnp.dot(hk, wv_ref[...], preferred_element_type=jnp.float32)

        # banded causal mask, built once per tile as an additive bias
        rows = q0 + lax.broadcasted_iota(jnp.int32, (tq, Lk), 0)
        cols = k0 + lax.broadcasted_iota(jnp.int32, (tq, Lk), 1)
        band = (cols <= rows) & ((rows - cols) < window_size)
        bias = jnp.where(band, 0.0, neg).astype(jnp.float32)

        wo = wo_ref[...]                       # (H, H) bf16
        attn = jnp.zeros((tq, H), jnp.float32)
        for hh in range(num_heads):            # heads are few; rot is folded
            sl = slice(hh * dh, (hh + 1) * dh)
            s = jnp.dot(q[:, sl].astype(bf16), k[:, sl].astype(bf16).T,
                        preferred_element_type=jnp.float32) * scale + bias
            m = jnp.max(s, axis=-1, keepdims=True)
            p = jnp.exp(s - m)
            p = p / jnp.sum(p, axis=-1, keepdims=True)
            ph = jnp.dot(p.astype(bf16), v[:, sl].astype(bf16),
                         preferred_element_type=jnp.float32)
            # accumulate straight through Wo -> no (S, H) scratch round trip
            attn = attn + jnp.dot(ph.astype(bf16), wo[sl, :],
                                  preferred_element_type=jnp.float32)

        x1 = xq + attn                         # (tq, H) f32 residual

        # ---- router: top-k experts, softmax-renormalized gates (f32) ----
        h2 = _rmsnorm(x1, g2_ref[...])
        h2_b = h2.astype(bf16)
        logits = jnp.dot(h2_b, wr_ref[...], preferred_element_type=jnp.float32)

        col = lax.broadcasted_iota(jnp.int32, (tq, E), 1)
        remaining = logits
        selected = jnp.zeros((tq, E), dtype=jnp.bool_)
        for _ in range(n_experts_per_token):
            mx = jnp.max(remaining, axis=-1, keepdims=True)
            is_max = remaining >= mx
            first = jnp.min(jnp.where(is_max, col, E), axis=-1, keepdims=True)
            sel = col == first
            selected = selected | sel
            remaining = jnp.where(sel, neg, remaining)
        gl = jnp.where(selected, logits, neg)
        gm = jnp.max(gl, axis=-1, keepdims=True)
        ge = jnp.where(selected, jnp.exp(gl - gm), 0.0)
        gates = ge / jnp.sum(ge, axis=-1, keepdims=True)

        h2_scr[...] = h2_b
        gates_scr[...] = gates
        acc_scr[...] = x1      # seed the MoE accumulator with the residual

    # --------------- one streamed expert per grid step ------------------------
    # TODO(synk): skip experts with zero routed gate mass (pl.when on a scalar
    # flag) or gather tokens megablocks-style via PrefetchScalarGridSpec; kept
    # dense per tile here for robustness.
    h2_b = h2_scr[...]                                        # (tq, H) bf16
    mid = jnp.dot(h2_b, w1_ref[0], preferred_element_type=jnp.float32)
    mid = jax.nn.gelu(mid, approximate=True)
    oexp = jnp.dot(mid.astype(bf16), w2_ref[0],
                   preferred_element_type=jnp.float32)        # (tq, H)
    eid = lax.broadcasted_iota(jnp.int32, (tq, E), 1)
    gate_e = jnp.sum(jnp.where(eid == e_idx, gates_scr[...], 0.0),
                     axis=-1, keepdims=True)                  # (tq, 1)
    acc_scr[...] = acc_scr[...] + gate_e * oexp

    @pl.when(e_idx == num_experts - 1)
    def _finalize():
        o_ref[0] = acc_scr[...].astype(o_ref.dtype)


def prepare_params(params, num_heads):
    """Fold the rotation matrix into Wq/Wk and cast matmul weights to bf16."""
    g1, g2, wq, wk, wv, wo, rot, wr, w1, w2 = params
    H = wq.shape[0]
    dh = H // num_heads

    def fold(w):  # (h @ W[:, sl]) @ rot == h @ (W[:, sl] @ rot)  per head
        return jnp.einsum("ihd,de->ihe", w.reshape(H, num_heads, dh),
                          rot).reshape(H, H)

    bf = lambda a: a.astype(jnp.bfloat16)
    return (g1, g2, bf(fold(wq)), bf(fold(wk)), bf(wv), bf(wo), bf(wr),
            bf(w1), bf(w2))


def transformer_block(x, params, *, num_heads, window_size,
                      n_experts_per_token, q_tile=None):
    B, S, H = x.shape
    g1, g2, wq, wk, wv, wo, wr, w1, w2 = prepare_params(params, num_heads)
    E, _, dff = w1.shape
    dh = H // num_heads

    tq = q_tile if q_tile is not None else min(S, 256)
    assert S % tq == 0, "seq length must be divisible by the query tile"
    nq = S // tq
    # fixed K/V slab length (sublane-rounded) that always covers the window
    Lk = min(((tq + window_size - 1 + 7) // 8) * 8, S)

    kernel = functools.partial(
        transformer_block_kernel,
        num_heads=num_heads, window_size=window_size,
        n_experts_per_token=n_experts_per_token, num_experts=E,
        q_tile=tq, kv_len=Lk)

    const2 = lambda b, qi, e: (0, 0)

    flops = int(B * (2 * S * H * H * 4                       # q,k,v,o projections
                     + num_heads * 2 * S * Lk * dh * 2       # scores + p@v
                     + 2 * S * H * E                         # router
                     + E * 2 * S * (H * dff + dff * H)))     # experts (dense)
    transcendentals = int(B * (num_heads * S * Lk + E * S * dff + 2 * S * E))
    bytes_accessed = int(sum(int(a.size) * a.dtype.itemsize for a in
                             (x, g1, g2, wq, wk, wv, wo, wr, w1, w2))
                         + int(x.size) * x.dtype.itemsize)

    return pl.pallas_call(
        kernel,
        out_shape=jax.ShapeDtypeStruct((B, S, H), x.dtype),
        grid=(B, nq, E),
        in_specs=[
            pl.BlockSpec((1, S, H), lambda b, qi, e: (b, 0, 0)),    # x (per-batch seq)
            pl.BlockSpec((1, H), const2),                           # ln1 gamma
            pl.BlockSpec((1, H), const2),                           # ln2 gamma
            pl.BlockSpec((H, H), const2),                           # Wq (rot folded)
            pl.BlockSpec((H, H), const2),                           # Wk (rot folded)
            pl.BlockSpec((H, H), const2),                           # Wv
            pl.BlockSpec((H, H), const2),                           # Wo
            pl.BlockSpec((H, E), const2),                           # router
            pl.BlockSpec((1, H, dff), lambda b, qi, e: (e, 0, 0)),  # expert W1 (streamed)
            pl.BlockSpec((1, dff, H), lambda b, qi, e: (e, 0, 0)),  # expert W2 (streamed)
        ],
        out_specs=pl.BlockSpec((1, tq, H), lambda b, qi, e: (b, qi, 0)),
        scratch_shapes=[
            pltpu.VMEM((tq, H), jnp.bfloat16),   # h2 (post-norm MoE input)
            pltpu.VMEM((tq, E), jnp.float32),    # gates
            pltpu.VMEM((tq, H), jnp.float32),    # residual + MoE accumulator
        ],
        compiler_params=pltpu.CompilerParams(
            dimension_semantics=("parallel", "parallel", "arbitrary"),
            vmem_limit_bytes=64 * 1024 * 1024),
        cost_estimate=pl.CostEstimate(
            flops=flops, transcendentals=transcendentals,
            bytes_accessed=bytes_accessed),
    )(x, g1, g2, wq, wk, wv, wo, wr, w1, w2)


# --------------- pure-JAX reference (same math, same bf16-operand matmuls) ----
def reference_block(x, params, *, num_heads, window_size, n_experts_per_token):
    g1, g2, wq, wk, wv, wo, wr, w1, w2 = prepare_params(params, num_heads)
    B, S, H = x.shape
    dh = H // num_heads
    E = wr.shape[1]
    scale = jnp.float32(1.0 / (dh ** 0.5))

    def bdot(a, b):
        return jnp.dot(a.astype(jnp.bfloat16), b.astype(jnp.bfloat16),
                       preferred_element_type=jnp.float32)

    def one(xb):
        h = _rmsnorm(xb, g1)
        q, k, v = bdot(h, wq), bdot(h, wk), bdot(h, wv)
        rows = jnp.arange(S)[:, None]
        cols = jnp.arange(S)[None, :]
        mask = (cols <= rows) & ((rows - cols) < window_size)
        attn = jnp.zeros((S, H), jnp.float32)
        for hh in range(num_heads):
            sl = slice(hh * dh, (hh + 1) * dh)
            s = bdot(q[:, sl], k[:, sl].T) * scale
            s = jnp.where(mask, s, -1e30)
            m = jnp.max(s, axis=-1, keepdims=True)
            p = jnp.exp(s - m)
            p = p / jnp.sum(p, axis=-1, keepdims=True)
            attn = attn + bdot(bdot(p, v[:, sl]), wo[sl, :])
        x1 = xb + attn

        h2 = _rmsnorm(x1, g2)
        logits = bdot(h2, wr)
        col = jnp.broadcast_to(jnp.arange(E)[None, :], (S, E))
        remaining, selected = logits, jnp.zeros((S, E), bool)
        for _ in range(n_experts_per_token):
            mx = jnp.max(remaining, axis=-1, keepdims=True)
            is_max = remaining >= mx
            first = jnp.min(jnp.where(is_max, col, E), axis=-1, keepdims=True)
            sel = col == first
            selected = selected | sel
            remaining = jnp.where(sel, -1e30, remaining)
        gl = jnp.where(selected, logits, -1e30)
        ge = jnp.where(selected, jnp.exp(gl - jnp.max(gl, -1, keepdims=True)), 0.0)
        gates = ge / jnp.sum(ge, axis=-1, keepdims=True)
        moe = jnp.zeros((S, H), jnp.float32)
        for e in range(E):
            mid = jax.nn.gelu(bdot(h2, w1[e]), approximate=True)
            moe = moe + gates[:, e:e + 1] * bdot(mid, w2[e])
        return x1 + moe

    return jax.vmap(one)(x)


def init_params(key, H, num_heads, d_ff, num_experts):
    dh = H // num_heads
    ks = jax.random.split(key, 8)
    scale = 0.05
    g1 = jnp.ones((1, H), jnp.float32)
    g2 = jnp.ones((1, H), jnp.float32)
    wq = scale * jax.random.normal(ks[0], (H, H), jnp.float32)
    wk = scale * jax.random.normal(ks[1], (H, H), jnp.float32)
    wv = scale * jax.random.normal(ks[2], (H, H), jnp.float32)
    wo = scale * jax.random.normal(ks[3], (H, H), jnp.float32)
    # deterministic RoPE-style block-diagonal rotation matrix (dh x dh)
    angles = jnp.arange(dh // 2, dtype=jnp.float32) * 0.5
    c, s = jnp.cos(angles), jnp.sin(angles)
    rot = jnp.zeros((dh, dh), jnp.float32)
    idx = jnp.arange(dh // 2)
    rot = rot.at[2 * idx, 2 * idx].set(c).at[2 * idx, 2 * idx + 1].set(-s)
    rot = rot.at[2 * idx + 1, 2 * idx].set(s).at[2 * idx + 1, 2 * idx + 1].set(c)
    wr = scale * jax.random.normal(ks[4], (H, num_experts), jnp.float32)
    w1 = scale * jax.random.normal(ks[5], (num_experts, H, d_ff), jnp.float32)
    w2 = scale * jax.random.normal(ks[6], (num_experts, d_ff, H), jnp.float32)
    return (g1, g2, wq, wk, wv, wo, rot, wr, w1, w2)


if __name__ == "__main__":
    hidden_size, num_heads, window_size = 32, 4, 4
    d_ff, num_experts, n_experts_per_token = 64, 4, 2
    batch, seq = 2, 8

    key = jax.random.PRNGKey(0)
    kx, kp = jax.random.split(key)
    x = jax.random.normal(kx, (batch, seq, hidden_size), jnp.float32)
    params = init_params(kp, hidden_size, num_heads, d_ff, num_experts)

    out = transformer_block(
        x, params, num_heads=num_heads, window_size=window_size,
        n_experts_per_token=n_experts_per_token)
    out = jax.block_until_ready(out)

    ref = reference_block(
        x, params, num_heads=num_heads, window_size=window_size,
        n_experts_per_token=n_experts_per_token)
    assert out.shape == (batch, seq, hidden_size)
    assert jnp.allclose(out, ref, rtol=2e-3, atol=2e-3), "mismatch vs reference"
    print("KERNEL_OK")
</pallas_src>

<mosaic_0001>
module attributes {stable_mosaic.version = 11 : i64} {
  func.func @transformer_block_kernel(%arg0: i32, %arg1: i32, %arg2: i32, %arg3: memref<1x8x32xf32, #tpu.memory_space<vmem>>, %arg4: memref<1x32xf32, #tpu.memory_space<vmem>>, %arg5: memref<1x32xf32, #tpu.memory_space<vmem>>, %arg6: memref<32x32xbf16, #tpu.memory_space<vmem>>, %arg7: memref<32x32xbf16, #tpu.memory_space<vmem>>, %arg8: memref<32x32xbf16, #tpu.memory_space<vmem>>, %arg9: memref<32x32xbf16, #tpu.memory_space<vmem>>, %arg10: memref<32x4xbf16, #tpu.memory_space<vmem>>, %arg11: memref<1x32x64xbf16, #tpu.memory_space<vmem>>, %arg12: memref<1x64x32xbf16, #tpu.memory_space<vmem>>, %arg13: memref<1x8x32xf32, #tpu.memory_space<vmem>>, %arg14: memref<8x32xbf16, #tpu.memory_space<vmem>>, %arg15: memref<8x4xf32, #tpu.memory_space<vmem>>, %arg16: memref<8x32xf32, #tpu.memory_space<vmem>>) attributes {dimension_semantics = [#tpu.dimension_semantics<parallel>, #tpu.dimension_semantics<parallel>, #tpu.dimension_semantics<arbitrary>], iteration_bounds = array<i64: 2, 1, 4>, scalar_prefetch = 0 : i64, scratch_operands = 3 : i64, tpu.core_type = #tpu.core_type<tc>, window_params = [{transform_indices = @transform_0, window_bounds = array<i64: 1, 8, 32>}, {pipeline_mode = #tpu.pipeline_mode<synchronous>, transform_indices = @transform_1, window_bounds = array<i64: 1, 32>}, {pipeline_mode = #tpu.pipeline_mode<synchronous>, transform_indices = @transform_2, window_bounds = array<i64: 1, 32>}, {pipeline_mode = #tpu.pipeline_mode<synchronous>, transform_indices = @transform_3, window_bounds = array<i64: 32, 32>}, {pipeline_mode = #tpu.pipeline_mode<synchronous>, transform_indices = @transform_4, window_bounds = array<i64: 32, 32>}, {pipeline_mode = #tpu.pipeline_mode<synchronous>, transform_indices = @transform_5, window_bounds = array<i64: 32, 32>}, {pipeline_mode = #tpu.pipeline_mode<synchronous>, transform_indices = @transform_6, window_bounds = array<i64: 32, 32>}, {pipeline_mode = #tpu.pipeline_mode<synchronous>, transform_indices = @transform_7, window_bounds = array<i64: 32, 4>}, {transform_indices = @transform_8, window_bounds = array<i64: 1, 32, 64>}, {transform_indices = @transform_9, window_bounds = array<i64: 1, 64, 32>}, {transform_indices = @transform_10, window_bounds = array<i64: 1, 8, 32>}]} {
    %c8_i32 = arith.constant 8 : i32
    %0 = arith.muli %arg1, %c8_i32 : i32
    %c8_i32_0 = arith.constant 8 : i32
    %1 = arith.addi %0, %c8_i32_0 : i32
    %c8_i32_1 = arith.constant 8 : i32
    %2 = arith.subi %1, %c8_i32_1 : i32
    %c0_i32 = arith.constant 0 : i32
    %3 = arith.maxsi %2, %c0_i32 : i32
    %c0_i32_2 = arith.constant 0 : i32
    %4 = arith.cmpi eq, %arg2, %c0_i32_2 : i32
    %5 = arith.extui %4 : i1 to i32
    %cst = arith.constant -1.000000e+30 : f32
    %cst_3 = arith.constant 0.353553385 : f32
    %c0_i32_4 = arith.constant 0 : i32
    %6 = arith.cmpi ne, %5, %c0_i32_4 : i32
    scf.if %6 {
      %c0_27 = arith.constant 0 : index
      %44 = arith.index_cast %0 : i32 to index
      %c0_28 = arith.constant 0 : index
      %45 = vector.load %arg3[%c0_27, %44, %c0_28] : memref<1x8x32xf32, #tpu.memory_space<vmem>>, vector<1x8x32xf32>
      %46 = vector.shape_cast %45 : vector<1x8x32xf32> to vector<8x32xf32>
      %c0_29 = arith.constant 0 : index
      %47 = arith.index_cast %3 : i32 to index
      %c0_30 = arith.constant 0 : index
      %48 = vector.load %arg3[%c0_29, %47, %c0_30] : memref<1x8x32xf32, #tpu.memory_space<vmem>>, vector<1x8x32xf32>
      %49 = vector.shape_cast %48 : vector<1x8x32xf32> to vector<8x32xf32>
      %c0_31 = arith.constant 0 : index
      %c0_32 = arith.constant 0 : index
      %50 = vector.load %arg4[%c0_31, %c0_32] : memref<1x32xf32, #tpu.memory_space<vmem>>, vector<1x32xf32>
      %51 = arith.mulf %46, %46 : vector<8x32xf32>
      %cst_33 = arith.constant dense<0.000000e+00> : vector<8xf32>
      %52 = vector.multi_reduction <add>, %51, %cst_33 [1] : vector<8x32xf32> to vector<8xf32>
      %53 = vector.shape_cast %52 : vector<8xf32> to vector<8x1xf32>
      %cst_34 = arith.constant 3.200000e+01 : f32
      %54 = vector.broadcast %cst_34 : f32 to vector<8x1xf32>
      %55 = arith.divf %53, %54 : vector<8x1xf32>
      %cst_35 = arith.constant 9.99999997E-7 : f32
      %56 = vector.broadcast %cst_35 : f32 to vector<8x1xf32>
      %57 = arith.addf %55, %56 : vector<8x1xf32>
      %58 = math.rsqrt %57 : vector<8x1xf32>
      %59 = vector.broadcast %58 : vector<8x1xf32> to vector<8x32xf32>
      %60 = arith.mulf %46, %59 : vector<8x32xf32>
      %61 = vector.broadcast %50 : vector<1x32xf32> to vector<8x32xf32>
      %62 = arith.mulf %60, %61 : vector<8x32xf32>
      %63 = arith.truncf %62 : vector<8x32xf32> to vector<8x32xbf16>
      %64 = arith.mulf %49, %49 : vector<8x32xf32>
      %cst_36 = arith.constant dense<0.000000e+00> : vector<8xf32>
      %65 = vector.multi_reduction <add>, %64, %cst_36 [1] : vector<8x32xf32> to vector<8xf32>
      %66 = vector.shape_cast %65 : vector<8xf32> to vector<8x1xf32>
      %cst_37 = arith.constant 3.200000e+01 : f32
      %67 = vector.broadcast %cst_37 : f32 to vector<8x1xf32>
      %68 = arith.divf %66, %67 : vector<8x1xf32>
      %cst_38 = arith.constant 9.99999997E-7 : f32
      %69 = vector.broadcast %cst_38 : f32 to vector<8x1xf32>
      %70 = arith.addf %68, %69 : vector<8x1xf32>
      %71 = math.rsqrt %70 : vector<8x1xf32>
      %72 = vector.broadcast %71 : vector<8x1xf32> to vector<8x32xf32>
      %73 = arith.mulf %49, %72 : vector<8x32xf32>
      %74 = vector.broadcast %50 : vector<1x32xf32> to vector<8x32xf32>
      %75 = arith.mulf %73, %74 : vector<8x32xf32>
      %76 = arith.truncf %75 : vector<8x32xf32> to vector<8x32xbf16>
      %c0_39 = arith.constant 0 : index
      %c0_40 = arith.constant 0 : index
      %77 = vector.load %arg6[%c0_39, %c0_40] : memref<32x32xbf16, #tpu.memory_space<vmem>>, vector<32x32xbf16>
      %cst_41 = arith.constant dense<0.000000e+00> : vector<8x32xf32>
      %78 = tpu.matmul %63, %77, %cst_41 {dimension_numbers = #tpu.dot_dimension_numbers<[1], [0], [0], [1], [0, 0, 1, 1], [], []>} : vector<8x32xbf16>, vector<32x32xbf16>, vector<8x32xf32> -> vector<8x32xf32>
      %c0_42 = arith.constant 0 : index
      %c0_43 = arith.constant 0 : index
      %79 = vector.load %arg7[%c0_42, %c0_43] : memref<32x32xbf16, #tpu.memory_space<vmem>>, vector<32x32xbf16>
      %cst_44 = arith.constant dense<0.000000e+00> : vector<8x32xf32>
      %80 = tpu.matmul %76, %79, %cst_44 {dimension_numbers = #tpu.dot_dimension_numbers<[1], [0], [0], [1], [0, 0, 1, 1], [], []>} : vector<8x32xbf16>, vector<32x32xbf16>, vector<8x32xf32> -> vector<8x32xf32>
      %c0_45 = arith.constant 0 : index
      %c0_46 = arith.constant 0 : index
      %81 = vector.load %arg8[%c0_45, %c0_46] : memref<32x32xbf16, #tpu.memory_space<vmem>>, vector<32x32xbf16>
      %cst_47 = arith.constant dense<0.000000e+00> : vector<8x32xf32>
      %82 = tpu.matmul %76, %81, %cst_47 {dimension_numbers = #tpu.dot_dimension_numbers<[1], [0], [0], [1], [0, 0, 1, 1], [], []>} : vector<8x32xbf16>, vector<32x32xbf16>, vector<8x32xf32> -> vector<8x32xf32>
      %83 = tpu.iota {dimensions = array<i32: 0>} : vector<8x8xi32>
      %84 = vector.broadcast %0 : i32 to vector<8x8xi32>
      %85 = arith.addi %84, %83 : vector<8x8xi32>
      %86 = tpu.iota {dimensions = array<i32: 1>} : vector<8x8xi32>
      %87 = vector.broadcast %3 : i32 to vector<8x8xi32>
      %88 = arith.addi %87, %86 : vector<8x8xi32>
      %89 = arith.cmpi sle, %88, %85 : vector<8x8xi32>
      %90 = arith.subi %85, %88 : vector<8x8xi32>
      %c4_i32 = arith.constant 4 : i32
      %91 = vector.broadcast %c4_i32 : i32 to vector<8x8xi32>
      %92 = arith.cmpi slt, %90, %91 : vector<8x8xi32>
      %93 = arith.andi %89, %92 : vector<8x8xi1>
      %cst_48 = arith.constant 0.000000e+00 : f32
      %94 = vector.broadcast %cst_48 : f32 to vector<8x8xf32>
      %95 = vector.broadcast %cst : f32 to vector<8x8xf32>
      %96 = arith.select %93, %94, %95 : vector<8x8xi1>, vector<8x8xf32>
      %c0_49 = arith.constant 0 : index
      %c0_50 = arith.constant 0 : index
      %97 = vector.load %arg9[%c0_49, %c0_50] : memref<32x32xbf16, #tpu.memory_space<vmem>>, vector<32x32xbf16>
      %cst_51 = arith.constant 0.000000e+00 : f32
      %98 = vector.broadcast %cst_51 : f32 to vector<8x32xf32>
      %99 = vector.extract_strided_slice %78 {offsets = [0, 0], sizes = [8, 8], strides = [1, 1]} : vector<8x32xf32> to vector<8x8xf32>
      %100 = arith.truncf %99 : vector<8x8xf32> to vector<8x8xbf16>
      %101 = vector.extract_strided_slice %80 {offsets = [0, 0], sizes = [8, 8], strides = [1, 1]} : vector<8x32xf32> to vector<8x8xf32>
      %102 = arith.truncf %101 : vector<8x8xf32> to vector<8x8xbf16>
      %103 = tpu.transpose %102, [1, 0] : vector<8x8xbf16> -> vector<8x8xbf16>
      %cst_52 = arith.constant dense<0.000000e+00> : vector<8x8xf32>
      %104 = tpu.matmul %100, %103, %cst_52 {dimension_numbers = #tpu.dot_dimension_numbers<[1], [0], [0], [1], [0, 0, 1, 1], [], []>} : vector<8x8xbf16>, vector<8x8xbf16>, vector<8x8xf32> -> vector<8x8xf32>
      %105 = vector.broadcast %cst_3 : f32 to vector<8x8xf32>
      %106 = arith.mulf %104, %105 : vector<8x8xf32>
      %107 = arith.addf %106, %96 : vector<8x8xf32>
      %cst_53 = arith.constant dense<0xFF800000> : vector<8xf32>
      %108 = vector.multi_reduction <maximumf>, %107, %cst_53 [1] : vector<8x8xf32> to vector<8xf32>
      %109 = vector.shape_cast %108 : vector<8xf32> to vector<8x1xf32>
      %110 = vector.broadcast %109 : vector<8x1xf32> to vector<8x8xf32>
      %111 = arith.subf %107, %110 : vector<8x8xf32>
      %112 = math.exp %111 : vector<8x8xf32>
      %cst_54 = arith.constant dense<0.000000e+00> : vector<8xf32>
      %113 = vector.multi_reduction <add>, %112, %cst_54 [1] : vector<8x8xf32> to vector<8xf32>
      %114 = vector.shape_cast %113 : vector<8xf32> to vector<8x1xf32>
      %115 = vector.broadcast %114 : vector<8x1xf32> to vector<8x8xf32>
      %116 = arith.divf %112, %115 : vector<8x8xf32>
      %117 = arith.truncf %116 : vector<8x8xf32> to vector<8x8xbf16>
      %118 = vector.extract_strided_slice %82 {offsets = [0, 0], sizes = [8, 8], strides = [1, 1]} : vector<8x32xf32> to vector<8x8xf32>
      %119 = arith.truncf %118 : vector<8x8xf32> to vector<8x8xbf16>
      %cst_55 = arith.constant dense<0.000000e+00> : vector<8x8xf32>
      %120 = tpu.matmul %117, %119, %cst_55 {dimension_numbers = #tpu.dot_dimension_numbers<[1], [0], [0], [1], [0, 0, 1, 1], [], []>} : vector<8x8xbf16>, vector<8x8xbf16>, vector<8x8xf32> -> vector<8x8xf32>
      %121 = arith.truncf %120 : vector<8x8xf32> to vector<8x8xbf16>
      %122 = vector.extract_strided_slice %97 {offsets = [0, 0], sizes = [8, 32], strides = [1, 1]} : vector<32x32xbf16> to vector<8x32xbf16>
      %cst_56 = arith.constant dense<0.000000e+00> : vector<8x32xf32>
      %123 = tpu.matmul %121, %122, %cst_56 {dimension_numbers = #tpu.dot_dimension_numbers<[1], [0], [0], [1], [0, 0, 1, 1], [], []>} : vector<8x8xbf16>, vector<8x32xbf16>, vector<8x32xf32> -> vector<8x32xf32>
      %124 = arith.addf %98, %123 : vector<8x32xf32>
      %125 = vector.extract_strided_slice %78 {offsets = [0, 8], sizes = [8, 8], strides = [1, 1]} : vector<8x32xf32> to vector<8x8xf32>
      %126 = arith.truncf %125 : vector<8x8xf32> to vector<8x8xbf16>
      %127 = vector.extract_strided_slice %80 {offsets = [0, 8], sizes = [8, 8], strides = [1, 1]} : vector<8x32xf32> to vector<8x8xf32>
      %128 = arith.truncf %127 : vector<8x8xf32> to vector<8x8xbf16>
      %129 = tpu.transpose %128, [1, 0] : vector<8x8xbf16> -> vector<8x8xbf16>
      %cst_57 = arith.constant dense<0.000000e+00> : vector<8x8xf32>
      %130 = tpu.matmul %126, %129, %cst_57 {dimension_numbers = #tpu.dot_dimension_numbers<[1], [0], [0], [1], [0, 0, 1, 1], [], []>} : vector<8x8xbf16>, vector<8x8xbf16>, vector<8x8xf32> -> vector<8x8xf32>
      %131 = vector.broadcast %cst_3 : f32 to vector<8x8xf32>
      %132 = arith.mulf %130, %131 : vector<8x8xf32>
      %133 = arith.addf %132, %96 : vector<8x8xf32>
      %cst_58 = arith.constant dense<0xFF800000> : vector<8xf32>
      %134 = vector.multi_reduction <maximumf>, %133, %cst_58 [1] : vector<8x8xf32> to vector<8xf32>
      %135 = vector.shape_cast %134 : vector<8xf32> to vector<8x1xf32>
      %136 = vector.broadcast %135 : vector<8x1xf32> to vector<8x8xf32>
      %137 = arith.subf %133, %136 : vector<8x8xf32>
      %138 = math.exp %137 : vector<8x8xf32>
      %cst_59 = arith.constant dense<0.000000e+00> : vector<8xf32>
      %139 = vector.multi_reduction <add>, %138, %cst_59 [1] : vector<8x8xf32> to vector<8xf32>
      %140 = vector.shape_cast %139 : vector<8xf32> to vector<8x1xf32>
      %141 = vector.broadcast %140 : vector<8x1xf32> to vector<8x8xf32>
      %142 = arith.divf %138, %141 : vector<8x8xf32>
      %143 = arith.truncf %142 : vector<8x8xf32> to vector<8x8xbf16>
      %144 = vector.extract_strided_slice %82 {offsets = [0, 8], sizes = [8, 8], strides = [1, 1]} : vector<8x32xf32> to vector<8x8xf32>
      %145 = arith.truncf %144 : vector<8x8xf32> to vector<8x8xbf16>
      %cst_60 = arith.constant dense<0.000000e+00> : vector<8x8xf32>
      %146 = tpu.matmul %143, %145, %cst_60 {dimension_numbers = #tpu.dot_dimension_numbers<[1], [0], [0], [1], [0, 0, 1, 1], [], []>} : vector<8x8xbf16>, vector<8x8xbf16>, vector<8x8xf32> -> vector<8x8xf32>
      %147 = arith.truncf %146 : vector<8x8xf32> to vector<8x8xbf16>
      %148 = vector.extract_strided_slice %97 {offsets = [8, 0], sizes = [8, 32], strides = [1, 1]} : vector<32x32xbf16> to vector<8x32xbf16>
      %cst_61 = arith.constant dense<0.000000e+00> : vector<8x32xf32>
      %149 = tpu.matmul %147, %148, %cst_61 {dimension_numbers = #tpu.dot_dimension_numbers<[1], [0], [0], [1], [0, 0, 1, 1], [], []>} : vector<8x8xbf16>, vector<8x32xbf16>, vector<8x32xf32> -> vector<8x32xf32>
      %150 = arith.addf %124, %149 : vector<8x32xf32>
      %151 = vector.extract_strided_slice %78 {offsets = [0, 16], sizes = [8, 8], strides = [1, 1]} : vector<8x32xf32> to vector<8x8xf32>
      %152 = arith.truncf %151 : vector<8x8xf32> to vector<8x8xbf16>
      %153 = vector.extract_strided_slice %80 {offsets = [0, 16], sizes = [8, 8], strides = [1, 1]} : vector<8x32xf32> to vector<8x8xf32>
      %154 = arith.truncf %153 : vector<8x8xf32> to vector<8x8xbf16>
      %155 = tpu.transpose %154, [1, 0] : vector<8x8xbf16> -> vector<8x8xbf16>
      %cst_62 = arith.constant dense<0.000000e+00> : vector<8x8xf32>
      %156 = tpu.matmul %152, %155, %cst_62 {dimension_numbers = #tpu.dot_dimension_numbers<[1], [0], [0], [1], [0, 0, 1, 1], [], []>} : vector<8x8xbf16>, vector<8x8xbf16>, vector<8x8xf32> -> vector<8x8xf32>
      %157 = vector.broadcast %cst_3 : f32 to vector<8x8xf32>
      %158 = arith.mulf %156, %157 : vector<8x8xf32>
      %159 = arith.addf %158, %96 : vector<8x8xf32>
      %cst_63 = arith.constant dense<0xFF800000> : vector<8xf32>
      %160 = vector.multi_reduction <maximumf>, %159, %cst_63 [1] : vector<8x8xf32> to vector<8xf32>
      %161 = vector.shape_cast %160 : vector<8xf32> to vector<8x1xf32>
      %162 = vector.broadcast %161 : vector<8x1xf32> to vector<8x8xf32>
      %163 = arith.subf %159, %162 : vector<8x8xf32>
      %164 = math.exp %163 : vector<8x8xf32>
      %cst_64 = arith.constant dense<0.000000e+00> : vector<8xf32>
      %165 = vector.multi_reduction <add>, %164, %cst_64 [1] : vector<8x8xf32> to vector<8xf32>
      %166 = vector.shape_cast %165 : vector<8xf32> to vector<8x1xf32>
      %167 = vector.broadcast %166 : vector<8x1xf32> to vector<8x8xf32>
      %168 = arith.divf %164, %167 : vector<8x8xf32>
      %169 = arith.truncf %168 : vector<8x8xf32> to vector<8x8xbf16>
      %170 = vector.extract_strided_slice %82 {offsets = [0, 16], sizes = [8, 8], strides = [1, 1]} : vector<8x32xf32> to vector<8x8xf32>
      %171 = arith.truncf %170 : vector<8x8xf32> to vector<8x8xbf16>
      %cst_65 = arith.constant dense<0.000000e+00> : vector<8x8xf32>
      %172 = tpu.matmul %169, %171, %cst_65 {dimension_numbers = #tpu.dot_dimension_numbers<[1], [0], [0], [1], [0, 0, 1, 1], [], []>} : vector<8x8xbf16>, vector<8x8xbf16>, vector<8x8xf32> -> vector<8x8xf32>
      %173 = arith.truncf %172 : vector<8x8xf32> to vector<8x8xbf16>
      %174 = vector.extract_strided_slice %97 {offsets = [16, 0], sizes = [8, 32], strides = [1, 1]} : vector<32x32xbf16> to vector<8x32xbf16>
      %cst_66 = arith.constant dense<0.000000e+00> : vector<8x32xf32>
      %175 = tpu.matmul %173, %174, %cst_66 {dimension_numbers = #tpu.dot_dimension_numbers<[1], [0], [0], [1], [0, 0, 1, 1], [], []>} : vector<8x8xbf16>, vector<8x32xbf16>, vector<8x32xf32> -> vector<8x32xf32>
      %176 = arith.addf %150, %175 : vector<8x32xf32>
      %177 = vector.extract_strided_slice %78 {offsets = [0, 24], sizes = [8, 8], strides = [1, 1]} : vector<8x32xf32> to vector<8x8xf32>
      %178 = arith.truncf %177 : vector<8x8xf32> to vector<8x8xbf16>
      %179 = vector.extract_strided_slice %80 {offsets = [0, 24], sizes = [8, 8], strides = [1, 1]} : vector<8x32xf32> to vector<8x8xf32>
      %180 = arith.truncf %179 : vector<8x8xf32> to vector<8x8xbf16>
      %181 = tpu.transpose %180, [1, 0] : vector<8x8xbf16> -> vector<8x8xbf16>
      %cst_67 = arith.constant dense<0.000000e+00> : vector<8x8xf32>
      %182 = tpu.matmul %178, %181, %cst_67 {dimension_numbers = #tpu.dot_dimension_numbers<[1], [0], [0], [1], [0, 0, 1, 1], [], []>} : vector<8x8xbf16>, vector<8x8xbf16>, vector<8x8xf32> -> vector<8x8xf32>
      %183 = vector.broadcast %cst_3 : f32 to vector<8x8xf32>
      %184 = arith.mulf %182, %183 : vector<8x8xf32>
      %185 = arith.addf %184, %96 : vector<8x8xf32>
      %cst_68 = arith.constant dense<0xFF800000> : vector<8xf32>
      %186 = vector.multi_reduction <maximumf>, %185, %cst_68 [1] : vector<8x8xf32> to vector<8xf32>
      %187 = vector.shape_cast %186 : vector<8xf32> to vector<8x1xf32>
      %188 = vector.broadcast %187 : vector<8x1xf32> to vector<8x8xf32>
      %189 = arith.subf %185, %188 : vector<8x8xf32>
      %190 = math.exp %189 : vector<8x8xf32>
      %cst_69 = arith.constant dense<0.000000e+00> : vector<8xf32>
      %191 = vector.multi_reduction <add>, %190, %cst_69 [1] : vector<8x8xf32> to vector<8xf32>
      %192 = vector.shape_cast %191 : vector<8xf32> to vector<8x1xf32>
      %193 = vector.broadcast %192 : vector<8x1xf32> to vector<8x8xf32>
      %194 = arith.divf %190, %193 : vector<8x8xf32>
      %195 = arith.truncf %194 : vector<8x8xf32> to vector<8x8xbf16>
      %196 = vector.extract_strided_slice %82 {offsets = [0, 24], sizes = [8, 8], strides = [1, 1]} : vector<8x32xf32> to vector<8x8xf32>
      %197 = arith.truncf %196 : vector<8x8xf32> to vector<8x8xbf16>
      %cst_70 = arith.constant dense<0.000000e+00> : vector<8x8xf32>
      %198 = tpu.matmul %195, %197, %cst_70 {dimension_numbers = #tpu.dot_dimension_numbers<[1], [0], [0], [1], [0, 0, 1, 1], [], []>} : vector<8x8xbf16>, vector<8x8xbf16>, vector<8x8xf32> -> vector<8x8xf32>
      %199 = arith.truncf %198 : vector<8x8xf32> to vector<8x8xbf16>
      %200 = vector.extract_strided_slice %97 {offsets = [24, 0], sizes = [8, 32], strides = [1, 1]} : vector<32x32xbf16> to vector<8x32xbf16>
      %cst_71 = arith.constant dense<0.000000e+00> : vector<8x32xf32>
      %201 = tpu.matmul %199, %200, %cst_71 {dimension_numbers = #tpu.dot_dimension_numbers<[1], [0], [0], [1], [0, 0, 1, 1], [], []>} : vector<8x8xbf16>, vector<8x32xbf16>, vector<8x32xf32> -> vector<8x32xf32>
      %202 = arith.addf %176, %201 : vector<8x32xf32>
      %203 = arith.addf %46, %202 : vector<8x32xf32>
      %c0_72 = arith.constant 0 : index
      %c0_73 = arith.constant 0 : index
      %204 = vector.load %arg5[%c0_72, %c0_73] : memref<1x32xf32, #tpu.memory_space<vmem>>, vector<1x32xf32>
      %205 = arith.mulf %203, %203 : vector<8x32xf32>
      %cst_74 = arith.constant dense<0.000000e+00> : vector<8xf32>
      %206 = vector.multi_reduction <add>, %205, %cst_74 [1] : vector<8x32xf32> to vector<8xf32>
      %207 = vector.shape_cast %206 : vector<8xf32> to vector<8x1xf32>
      %cst_75 = arith.constant 3.200000e+01 : f32
      %208 = vector.broadcast %cst_75 : f32 to vector<8x1xf32>
      %209 = arith.divf %207, %208 : vector<8x1xf32>
      %cst_76 = arith.constant 9.99999997E-7 : f32
      %210 = vector.broadcast %cst_76 : f32 to vector<8x1xf32>
      %211 = arith.addf %209, %210 : vector<8x1xf32>
      %212 = math.rsqrt %211 : vector<8x1xf32>
      %213 = vector.broadcast %212 : vector<8x1xf32> to vector<8x32xf32>
      %214 = arith.mulf %203, %213 : vector<8x32xf32>
      %215 = vector.broadcast %204 : vector<1x32xf32> to vector<8x32xf32>
      %216 = arith.mulf %214, %215 : vector<8x32xf32>
      %217 = arith.truncf %216 : vector<8x32xf32> to vector<8x32xbf16>
      %c0_77 = arith.constant 0 : index
      %c0_78 = arith.constant 0 : index
      %218 = vector.load %arg10[%c0_77, %c0_78] : memref<32x4xbf16, #tpu.memory_space<vmem>>, vector<32x4xbf16>
      %cst_79 = arith.constant dense<0.000000e+00> : vector<8x4xf32>
      %219 = tpu.matmul %217, %218, %cst_79 {dimension_numbers = #tpu.dot_dimension_numbers<[1], [0], [0], [1], [0, 0, 1, 1], [], []>} : vector<8x32xbf16>, vector<32x4xbf16>, vector<8x4xf32> -> vector<8x4xf32>
      %220 = tpu.iota {dimensions = array<i32: 1>} : vector<8x4xi32>
      %false = arith.constant false
      %221 = vector.broadcast %false : i1 to vector<8x4xi1>
      %cst_80 = arith.constant dense<0xFF800000> : vector<8xf32>
      %222 = vector.multi_reduction <maximumf>, %219, %cst_80 [1] : vector<8x4xf32> to vector<8xf32>
      %223 = vector.shape_cast %222 : vector<8xf32> to vector<8x1xf32>
      %224 = vector.broadcast %223 : vector<8x1xf32> to vector<8x4xf32>
      %225 = arith.cmpf oge, %219, %224 : vector<8x4xf32>
      %c4_i32_81 = arith.constant 4 : i32
      %226 = vector.broadcast %c4_i32_81 : i32 to vector<8x4xi32>
      %227 = arith.select %225, %220, %226 : vector<8x4xi1>, vector<8x4xi32>
      %cst_82 = arith.constant dense<2147483647> : vector<8xi32>
      %228 = vector.multi_reduction <minsi>, %227, %cst_82 [1] : vector<8x4xi32> to vector<8xi32>
      %229 = vector.shape_cast %228 : vector<8xi32> to vector<8x1xi32>
      %230 = vector.broadcast %229 : vector<8x1xi32> to vector<8x4xi32>
      %231 = arith.cmpi eq, %220, %230 : vector<8x4xi32>
      %232 = arith.ori %221, %231 : vector<8x4xi1>
      %233 = vector.broadcast %cst : f32 to vector<8x4xf32>
      %234 = arith.select %231, %233, %219 : vector<8x4xi1>, vector<8x4xf32>
      %cst_83 = arith.constant dense<0xFF800000> : vector<8xf32>
      %235 = vector.multi_reduction <maximumf>, %234, %cst_83 [1] : vector<8x4xf32> to vector<8xf32>
      %236 = vector.shape_cast %235 : vector<8xf32> to vector<8x1xf32>
      %237 = vector.broadcast %236 : vector<8x1xf32> to vector<8x4xf32>
      %238 = arith.cmpf oge, %234, %237 : vector<8x4xf32>
      %c4_i32_84 = arith.constant 4 : i32
      %239 = vector.broadcast %c4_i32_84 : i32 to vector<8x4xi32>
      %240 = arith.select %238, %220, %239 : vector<8x4xi1>, vector<8x4xi32>
      %cst_85 = arith.constant dense<2147483647> : vector<8xi32>
      %241 = vector.multi_reduction <minsi>, %240, %cst_85 [1] : vector<8x4xi32> to vector<8xi32>
      %242 = vector.shape_cast %241 : vector<8xi32> to vector<8x1xi32>
      %243 = vector.broadcast %242 : vector<8x1xi32> to vector<8x4xi32>
      %244 = arith.cmpi eq, %220, %243 : vector<8x4xi32>
      %245 = arith.ori %232, %244 : vector<8x4xi1>
      %246 = vector.broadcast %cst : f32 to vector<8x4xf32>
      %247 = arith.select %245, %219, %246 : vector<8x4xi1>, vector<8x4xf32>
      %cst_86 = arith.constant dense<0xFF800000> : vector<8xf32>
      %248 = vector.multi_reduction <maximumf>, %247, %cst_86 [1] : vector<8x4xf32> to vector<8xf32>
      %249 = vector.shape_cast %248 : vector<8xf32> to vector<8x1xf32>
      %250 = vector.broadcast %249 : vector<8x1xf32> to vector<8x4xf32>
      %251 = arith.subf %247, %250 : vector<8x4xf32>
      %252 = math.exp %251 : vector<8x4xf32>
      %cst_87 = arith.constant 0.000000e+00 : f32
      %253 = vector.broadcast %cst_87 : f32 to vector<8x4xf32>
      %254 = arith.select %245, %252, %253 : vector<8x4xi1>, vector<8x4xf32>
      %cst_88 = arith.constant dense<0.000000e+00> : vector<8xf32>
      %255 = vector.multi_reduction <add>, %254, %cst_88 [1] : vector<8x4xf32> to vector<8xf32>
      %256 = vector.shape_cast %255 : vector<8xf32> to vector<8x1xf32>
      %257 = vector.broadcast %256 : vector<8x1xf32> to vector<8x4xf32>
      %258 = arith.divf %254, %257 : vector<8x4xf32>
      %c0_89 = arith.constant 0 : index
      %c0_90 = arith.constant 0 : index
      %259 = vector.load %arg14[%c0_89, %c0_90] : memref<8x32xbf16, #tpu.memory_space<vmem>>, vector<8x32xbf16>
      tpu.vector_store %arg14[%c0_89, %c0_90], %217 {strides = array<i32>} : memref<8x32xbf16, #tpu.memory_space<vmem>>, vector<8x32xbf16>,
      %c0_91 = arith.constant 0 : index
      %c0_92 = arith.constant 0 : index
      %260 = vector.load %arg15[%c0_91, %c0_92] : memref<8x4xf32, #tpu.memory_space<vmem>>, vector<8x4xf32>
      tpu.vector_store %arg15[%c0_91, %c0_92], %258 {strides = array<i32>} : memref<8x4xf32, #tpu.memory_space<vmem>>, vector<8x4xf32>,
      %c0_93 = arith.constant 0 : index
      %c0_94 = arith.constant 0 : index
      %261 = vector.load %arg16[%c0_93, %c0_94] : memref<8x32xf32, #tpu.memory_space<vmem>>, vector<8x32xf32>
      tpu.vector_store %arg16[%c0_93, %c0_94], %203 {strides = array<i32>} : memref<8x32xf32, #tpu.memory_space<vmem>>, vector<8x32xf32>,
    } else {
    }
    %c0 = arith.constant 0 : index
    %c0_5 = arith.constant 0 : index
    %7 = vector.load %arg14[%c0, %c0_5] : memref<8x32xbf16, #tpu.memory_space<vmem>>, vector<8x32xbf16>
    %c0_6 = arith.constant 0 : index
    %c0_7 = arith.constant 0 : index
    %c0_8 = arith.constant 0 : index
    %8 = vector.load %arg11[%c0_6, %c0_7, %c0_8] : memref<1x32x64xbf16, #tpu.memory_space<vmem>>, vector<1x32x64xbf16>
    %9 = vector.shape_cast %8 : vector<1x32x64xbf16> to vector<32x64xbf16>
    %cst_9 = arith.constant dense<0.000000e+00> : vector<8x64xf32>
    %10 = tpu.matmul %7, %9, %cst_9 {dimension_numbers = #tpu.dot_dimension_numbers<[1], [0], [0], [1], [0, 0, 1, 1], [], []>} : vector<8x32xbf16>, vector<32x64xbf16>, vector<8x64xf32> -> vector<8x64xf32>
    %11 = arith.mulf %10, %10 : vector<8x64xf32>
    %12 = arith.mulf %10, %11 : vector<8x64xf32>
    %cst_10 = arith.constant 4.471500e-02 : f32
    %13 = vector.broadcast %cst_10 : f32 to vector<8x64xf32>
    %14 = arith.mulf %13, %12 : vector<8x64xf32>
    %15 = arith.addf %10, %14 : vector<8x64xf32>
    %cst_11 = arith.constant 0.797884583 : f32
    %16 = vector.broadcast %cst_11 : f32 to vector<8x64xf32>
    %17 = arith.mulf %16, %15 : vector<8x64xf32>
    %18 = math.tanh %17 : vector<8x64xf32>
    %cst_12 = arith.constant 1.000000e+00 : f32
    %19 = vector.broadcast %cst_12 : f32 to vector<8x64xf32>
    %20 = arith.addf %19, %18 : vector<8x64xf32>
    %cst_13 = arith.constant 5.000000e-01 : f32
    %21 = vector.broadcast %cst_13 : f32 to vector<8x64xf32>
    %22 = arith.mulf %21, %20 : vector<8x64xf32>
    %23 = arith.mulf %10, %22 : vector<8x64xf32>
    %24 = arith.truncf %23 : vector<8x64xf32> to vector<8x64xbf16>
    %c0_14 = arith.constant 0 : index
    %c0_15 = arith.constant 0 : index
    %c0_16 = arith.constant 0 : index
    %25 = vector.load %arg12[%c0_14, %c0_15, %c0_16] : memref<1x64x32xbf16, #tpu.memory_space<vmem>>, vector<1x64x32xbf16>
    %26 = vector.shape_cast %25 : vector<1x64x32xbf16> to vector<64x32xbf16>
    %cst_17 = arith.constant dense<0.000000e+00> : vector<8x32xf32>
    %27 = tpu.matmul %24, %26, %cst_17 {dimension_numbers = #tpu.dot_dimension_numbers<[1], [0], [0], [1], [0, 0, 1, 1], [], []>} : vector<8x64xbf16>, vector<64x32xbf16>, vector<8x32xf32> -> vector<8x32xf32>
    %28 = tpu.iota {dimensions = array<i32: 1>} : vector<8x4xi32>
    %29 = vector.broadcast %arg2 : i32 to vector<8x4xi32>
    %30 = arith.cmpi eq, %28, %29 : vector<8x4xi32>
    %c0_18 = arith.constant 0 : index
    %c0_19 = arith.constant 0 : index
    %31 = vector.load %arg15[%c0_18, %c0_19] : memref<8x4xf32, #tpu.memory_space<vmem>>, vector<8x4xf32>
    %cst_20 = arith.constant 0.000000e+00 : f32
    %32 = vector.broadcast %cst_20 : f32 to vector<8x4xf32>
    %33 = arith.select %30, %31, %32 : vector<8x4xi1>, vector<8x4xf32>
    %cst_21 = arith.constant dense<0.000000e+00> : vector<8xf32>
    %34 = vector.multi_reduction <add>, %33, %cst_21 [1] : vector<8x4xf32> to vector<8xf32>
    %35 = vector.shape_cast %34 : vector<8xf32> to vector<8x1xf32>
    %c0_22 = arith.constant 0 : index
    %c0_23 = arith.constant 0 : index
    %36 = vector.load %arg16[%c0_22, %c0_23] : memref<8x32xf32, #tpu.memory_space<vmem>>, vector<8x32xf32>
    %37 = vector.broadcast %35 : vector<8x1xf32> to vector<8x32xf32>
    %38 = arith.mulf %37, %27 : vector<8x32xf32>
    %39 = arith.addf %36, %38 : vector<8x32xf32>
    %c0_24 = arith.constant 0 : index
    %c0_25 = arith.constant 0 : index
    %40 = vector.load %arg16[%c0_24, %c0_25] : memref<8x32xf32, #tpu.memory_space<vmem>>, vector<8x32xf32>
    tpu.vector_store %arg16[%c0_24, %c0_25], %39 {strides = array<i32>} : memref<8x32xf32, #tpu.memory_space<vmem>>, vector<8x32xf32>,
    %c3_i32 = arith.constant 3 : i32
    %41 = arith.cmpi eq, %arg2, %c3_i32 : i32
    %42 = arith.extui %41 : i1 to i32
    %c0_i32_26 = arith.constant 0 : i32
    %43 = arith.cmpi ne, %42, %c0_i32_26 : i32
    scf.if %43 {
      %c0_27 = arith.constant 0 : index
      %c0_28 = arith.constant 0 : index
      %44 = vector.load %arg16[%c0_27, %c0_28] : memref<8x32xf32, #tpu.memory_space<vmem>>, vector<8x32xf32>
      %c0_29 = arith.constant 0 : index
      %c0_30 = arith.constant 0 : index
      %c0_31 = arith.constant 0 : index
      %45 = vector.load %arg13[%c0_29, %c0_30, %c0_31] : memref<1x8x32xf32, #tpu.memory_space<vmem>>, vector<1x8x32xf32>
      %46 = vector.shape_cast %45 : vector<1x8x32xf32> to vector<8x32xf32>
      %47 = vector.shape_cast %44 : vector<8x32xf32> to vector<1x8x32xf32>
      tpu.vector_store %arg13[%c0_29, %c0_30, %c0_31], %47 {strides = array<i32>} : memref<1x8x32xf32, #tpu.memory_space<vmem>>, vector<1x8x32xf32>,
    } else {
    }
    return
  }
  func.func @transform_0(%arg0: i32, %arg1: i32, %arg2: i32) -> (i32, i32, i32) {
    %c0_i32 = arith.constant 0 : i32
    %c0_i32_0 = arith.constant 0 : i32
    %c0_i32_1 = arith.constant 0 : i32
    return %arg0, %c0_i32, %c0_i32_0 : i32, i32, i32
  }
  func.func @transform_1(%arg0: i32, %arg1: i32, %arg2: i32) -> (i32, i32) {
    %c0_i32 = arith.constant 0 : i32
    %c0_i32_0 = arith.constant 0 : i32
    %c0_i32_1 = arith.constant 0 : i32
    return %c0_i32, %c0_i32_0 : i32, i32
  }
  func.func @transform_2(%arg0: i32, %arg1: i32, %arg2: i32) -> (i32, i32) {
    %c0_i32 = arith.constant 0 : i32
    %c0_i32_0 = arith.constant 0 : i32
    %c0_i32_1 = arith.constant 0 : i32
    return %c0_i32, %c0_i32_0 : i32, i32
  }
  func.func @transform_3(%arg0: i32, %arg1: i32, %arg2: i32) -> (i32, i32) {
    %c0_i32 = arith.constant 0 : i32
    %c0_i32_0 = arith.constant 0 : i32
    %c0_i32_1 = arith.constant 0 : i32
    return %c0_i32, %c0_i32_0 : i32, i32
  }
  func.func @transform_4(%arg0: i32, %arg1: i32, %arg2: i32) -> (i32, i32) {
    %c0_i32 = arith.constant 0 : i32
    %c0_i32_0 = arith.constant 0 : i32
    %c0_i32_1 = arith.constant 0 : i32
    return %c0_i32, %c0_i32_0 : i32, i32
  }
  func.func @transform_5(%arg0: i32, %arg1: i32, %arg2: i32) -> (i32, i32) {
    %c0_i32 = arith.constant 0 : i32
    %c0_i32_0 = arith.constant 0 : i32
    %c0_i32_1 = arith.constant 0 : i32
    return %c0_i32, %c0_i32_0 : i32, i32
  }
  func.func @transform_6(%arg0: i32, %arg1: i32, %arg2: i32) -> (i32, i32) {
    %c0_i32 = arith.constant 0 : i32
    %c0_i32_0 = arith.constant 0 : i32
    %c0_i32_1 = arith.constant 0 : i32
    return %c0_i32, %c0_i32_0 : i32, i32
  }
  func.func @transform_7(%arg0: i32, %arg1: i32, %arg2: i32) -> (i32, i32) {
    %c0_i32 = arith.constant 0 : i32
    %c0_i32_0 = arith.constant 0 : i32
    %c0_i32_1 = arith.constant 0 : i32
    return %c0_i32, %c0_i32_0 : i32, i32
  }
  func.func @transform_8(%arg0: i32, %arg1: i32, %arg2: i32) -> (i32, i32, i32) {
    %c0_i32 = arith.constant 0 : i32
    %c0_i32_0 = arith.constant 0 : i32
    %c0_i32_1 = arith.constant 0 : i32
    return %arg2, %c0_i32, %c0_i32_0 : i32, i32, i32
  }
  func.func @transform_9(%arg0: i32, %arg1: i32, %arg2: i32) -> (i32, i32, i32) {
    %c0_i32 = arith.constant 0 : i32
    %c0_i32_0 = arith.constant 0 : i32
    %c0_i32_1 = arith.constant 0 : i32
    return %arg2, %c0_i32, %c0_i32_0 : i32, i32, i32
  }
  func.func @transform_10(%arg0: i32, %arg1: i32, %arg2: i32) -> (i32, i32, i32) {
    %c0_i32 = arith.constant 0 : i32
    %c0_i32_0 = arith.constant 0 : i32
    return %arg0, %arg1, %c0_i32 : i32, i32, i32
  }
}

</mosaic_0001>

<bundles_post_ra>
// kernel: tpu_custom_call.1
= control target key start
LH: loop header
LB: loop body
LE: loop exit
PB: predicated region body
PF: predicated region fallthrough
CT: control target
= control target key end

     0   :  { %15 = vsyncpa [#allocation6], 0  ;;  %s1983_s0 = inlined_call_operand.vmem [shape: f32[2,8,32], index: 0, kind: input, shape index: {}]   ;;  %s1984_s1 = inlined_call_operand.vmem [shape: f32[1,32], index: 1, kind: input, shape index: {}]   ;;  %s1985_s2 = inlined_call_operand.vmem [shape: f32[1,32], index: 2, kind: input, shape index: {}]   ;;  %s1986_s3 = inlined_call_operand.vmem [shape: bf16[32,32], index: 3, kind: input, shape index: {}]   ;;  %s1987_s4 = inlined_call_operand.vmem [shape: bf16[32,32], index: 4, kind: input, shape index: {}]   ;;  %s1988_s5 = inlined_call_operand.vmem [shape: bf16[32,32], index: 5, kind: input, shape index: {}]   ;;  %s1989_s6 = inlined_call_operand.vmem [shape: bf16[32,32], index: 6, kind: input, shape index: {}]   ;;  %s1990_s7 = inlined_call_operand.vmem [shape: bf16[32,4], index: 7, kind: input, shape index: {}]   ;;  %s1991_s8 = inlined_call_operand.vmem [shape: bf16[4,32,64], index: 8, kind: input, shape index: {}]   ;;  %s1992_s9 = inlined_call_operand.vmem [shape: bf16[4,64,32], index: 9, kind: input, shape index: {}]   ;;  %s1993_s10 = inlined_call_operand.hbm [shape: f32[2,8,32], index: 10, kind: output, shape index: {}]  }
   0x1   :  { %17 = vsyncpa [#allocation6 + $0x1], 0  ;;  %s1689_s13 = smov 0   ;;  %s1691_s14 = smov 0  }
   0x2   :  { %s1693_s15 = smov 0   ;;  %s1695_s16 = smov 0  }
   0x3   :  { %s1697_s17 = smov 0   ;;  %s1699_s18 = smov 0  }
   0x4   :  { %s1701_s19 = smov 0   ;;  %s1703_s20 = smov 0  }
   0x5 LB: > { %2003 = sst [smem:[#allocation8_spill]] %s1599_s13  ;;  %s1318_s21 = sadd.s32 4294967295, %s1627_s20   ;;  %s1627_s20 = sphi %s1703_s20, %s23_s20   ;;  %s1623_s19 = sphi %s1701_s19, %s2023_s19   ;;  %s1619_s18 = sphi %s1699_s18, %s2022_s18   ;;  %s1615_s17 = sphi %s1697_s17, %s2021_s17   ;;  %s1611_s16 = sphi %s1695_s16, %s2020_s16   ;;  %s1607_s15 = sphi %s1693_s15, %s2019_s15   ;;  %s1603_s14 = sphi %s1691_s14, %s2025_s14   ;;  %s1599_s13 = sphi %s1689_s13, %s2024_s13  }
   0x6   : > { %2004 = sst [smem:[#allocation9_spill]] %s1607_s15  ;;  %s1319_s22 = sadd.s32 4294967294, %s1627_s20  }
   0x7   : > { %2005 = sst [smem:[#allocation10_spill]] %s1619_s18  ;;  %s35_s23 = sadd.s32 1, %s1619_s18 }
   0x8   : > { %2006 = sst [smem:[#allocation11_spill]] %s1623_s19  ;;  %p36_p0 = scmp.ge.s32.totalorder %s35_s23, 4 }
   0x9   : > { %2007 = sst [smem:[#allocation12_spill]] %s1627_s20  ;;  %s42_s24 = sadd.s32 1, %s1623_s19 }
   0xa   : > { %p286_p1 = scmp.ne.s32.totalorder %s1607_s15, %s1603_s14  ;;  %p287_p2 = scmp.eq.s32.totalorder %s1318_s21, 7 }
   0xb   : > { %s2027_s23 = smov (%p36_p0, %s35_s23), 0  ;;  %s2029_s24 = smov (!%p36_p0, %s42_s24), %s1623_s19 }
   0xc   : > { %2008 = sst [smem:[#allocation13_spill]] %s2027_s23  ;;  %p1738_p3 = por %p287_p2, %p286_p1 }
   0xd   : > { %p292_p4 = scmp.ne.s32.totalorder %s1603_s14, %s1599_s13  ;;  %p44_p5 = scmp.ge.s32.totalorder %s2029_s24, 2 }
   0xe   : > { %p293_p6 = scmp.eq.s32.totalorder %s1319_s22, 7  ;;  %p1322_p7 = scmp.ge.s32.totalorder %s1627_s20, 1 }
   0xf   : > { %p355_p8 = scmp.lt.s32.totalorder %s1627_s20, 9  ;;  %s2031_s24 = smov (%p44_p5, %s2029_s24), 0 }
  0x10   : > { %2010 = sst [smem:[#allocation14_spill]] %s2031_s24  ;;  %p1748_p9 = por %p293_p6, %p292_p4 }
  0x11   : > { %p356_p10 = pnand %p1322_p7, %p355_p8  ;;  %s271_s27 = ssub.s32 %s1623_s19, %s2031_s24 }
  0x12   : > { %s2011_s26 = scalar_select %p1748_p9, 1, 0 }
  0x13   : > { %s276_s28 = sadd.s32 1, %s1607_s15  ;;  %p274_p11 = scmp.eq.s32.totalorder %s271_s27, 0 }
  0x14   : > { %2012 = sst [smem:[#allocation15_spill]] %s2011_s26  ;;  %359 = sbr.rel (%p356_p10) target bundleno = 3119 (0xc2f), region = 60 }
  0x15   : > { %s1756_s29 = scalar_select %p274_p11, %s1607_s15, %s276_s28  }
  0x16   : > { %s2000_s30 = sand.u32 (!%p356_p10), 1, %s1603_s14   ;;  %p402_p12 = scmp.lt.s32.totalorder (!%p356_p10), %s1615_s17, 1 }
  0x17   : > { %2013 = sst [smem:[#allocation16_spill]] %s1756_s29  ;;  %s1762_s11 = sshll.u32 (!%p356_p10), %s2000_s30, 3 }
  0x18   : > { %p406_p13 = scmp.lt.s32.totalorder (!%p356_p10), %s1611_s16, 3  ;;  %s401_s20 = scalar_lea.vmem (!%p356_p10), [#allocation5], %s1762_s11 }
  0x19   : > { %s403_s12 = scalar_select %p402_p12, %s1615_s17, 1 }
  0x1a   : > { %s407_s21 = scalar_select %p406_p13, %s1611_s16, 3 }
  0x1b   : > { %s1324_s22 = sshll.u32 %s403_s12, 3  ;;  %p1329_p0 = scmp.ne.s32.totalorder %s1611_s16, 0 }
  0x1c   : > { %s405_s24 = scalar_lea.vmem %s1983_s0, %s1324_s22  ;;  %s1409_s23 = sshll.u32 %s407_s21, 4 }
  0x1d   : > { %s1773_s29 = scalar_lea.vmem %s1991_s8, %s1409_s23  ;;  %s1410_s15 = sshll.u32 %s407_s21, 5 }
  0x1e   : > { %s1778_s30 = scalar_lea.vmem %s1992_s9, %s1410_s15  ;;  %423 = sbr.rel (%p1329_p0) target bundleno = 2806 (0xaf6), region = 64 }
  0x1f   : > { %s1630_s18 = smov (!%p1329_p0), 120   ;;  %s1631_s19 = smov (!%p1329_p0), 112  }
  0x20   : > { %s1632_s23 = smov (!%p1329_p0), 104  }
  0x23   : > { %v1782_v0 = vld [vmem:[%s405_s24] sm:$0xff]  ;;  %vm430_vm0 = vcmask 261120   ;;  %v1629_v3 = vmov 32.0   ;;  %v1414_v7 = vld [vmem:[%s1987_s4 + $0x8] sm:$0xff]  ;;  %vm590_vm8 = vcmask 64512   ;;  %vm641_vm9 = vcmask 1043456  }
  0x24   : > { %v459_v1 = vmul.f32 %v1782_v0, %v1782_v0  ;;  %1503 = vrcp.f32 %v1629_v3  ;;  %v1416_v8 = vld [vmem:[%s1988_s5 + $0x8] sm:$0xff]  ;;  %535 = vmatpush.bf16.msra.mxu1 %v1414_v7  ;;  %v1413_v10 = vld [vmem:[%s1987_s4] sm:$0xff]  ;;  %v571_v59 = vlaneseq }
  0x25   : > { %564 = vmatpush.bf16.msra.mxu2 %v1416_v8  ;;  %v1415_v11 = vld [vmem:[%s1988_s5] sm:$0xff]  ;;  %v1412_v13 = vld [vmem:[%s1986_s3 + $0x8] sm:$0xff] }
  0x26   : > { %v460_v2 = vsel %vm430_vm0, %v459_v1, 0.0  ;;  %503 = vmatpush.bf16.msra.mxu0 %v1412_v13  ;;  %v1411_v15 = vld [vmem:[%s1986_s3] sm:$0xff]  ;;  %v572_v60 = vshrl.u32 %v571_v59, 7  ;;  %v1831_v61 = vand.u32 127, %v571_v59  ;;  %v1633_v1 = vmov -1e+30  }
  0x27   : > { %461 = vadd.xlane.f32.xlu0 %v460_v2  ;;  %v1501_v30 = vld [vmem:[%s1984_s1] ss:$0 sm:$0xff] }
  0x28   : > { %536 = vmatpush.bf16.msra.mxu1 %v1413_v10  ;;  %v580_v62 = vsub.s32 %v572_v60, %v1831_v61  ;;  %vm579_vm10 = vcmp.le.s32.totalorder %v1831_v61, %v572_v60 }
  0x29   : > { %565 = vmatpush.bf16.msra.mxu2 %v1415_v11 }
  0x2a   : > { %v1504_v4 = vpop.eup %1503  ;;  %504 = vmatpush.bf16.msra.mxu0 %v1411_v15  ;;  %vm581_vm11 = vcmp.lt.s32.totalorder %v580_v62, 4 }
  0x2b   : > { %v435_v5 = vmul.f32 32.0, %v1504_v4  ;;  %vm439_vm1 = vweird.f32 %v1504_v4  ;;  %vm582_vm12 = vmand %vm579_vm10, %vm581_vm11 }
  0x2d   : > { %v436_v6 = vsub.f32 1.0, %v435_v5 }
  0x2f   : > { %432 = vadd.xlane.f32.xlu0 %v460_v2  ;;  %v437_v9 = vmul.f32 %v1504_v4, %v436_v6  ;;  %v1835_v2 = vsel %vm582_vm12, 0.0, %v1633_v1 }
  0x31   : > { %v438_v12 = vadd.f32 %v1504_v4, %v437_v9 }
  0x33   : > { %v1802_v14 = vsel %vm439_vm1, %v1504_v4, %v438_v12 }
  0x9a   : > { %v462_v16 = vpop.xlane.xlu0 %461 }
  0x9b   : > { %v463_v17 = vmul.f32 %v462_v16, %v1802_v14 }
  0x9d   : > { %v464_v18 = vadd.f32 1e-06, %v463_v17 }
  0x9f   : > { %1505 = vrsqrt.f32 %v464_v18  ;;  %vm471_vm3 = vweird.f32 %v464_v18 }
  0xa2   : > { %v433_v19 = vpop.xlane.xlu0 %432 }
  0xa3   : > { %v441_v20 = vmul.f32 %v1802_v14, %v433_v19 }
  0xa5   : > { %v1506_v21 = vpop.eup %1505  ;;  %v442_v22 = vadd.f32 1e-06, %v441_v20 }
  0xa6   : > { %v466_v23 = vmul.f32 %v1506_v21, %v464_v18  ;;  %vm472_vm2 = vweird.f32 %v1506_v21 }
  0xa7   : > { %1507 = vrsqrt.f32 %v442_v22  ;;  %vm473_vm4 = vmor %vm471_vm3, %vm472_vm2  ;;  %vm449_vm6 = vweird.f32 %v442_v22 }
  0xa8   : > { %v467_v24 = vmul.f32 %v1506_v21, %v466_v23 }
  0xaa   : > { %v468_v25 = vmul.f32 0.5, %v467_v24 }
  0xac   : > { %v469_v26 = vsub.f32 1.5, %v468_v25  ;;  %v584_v25 = vld [vmem:[%s1989_s6] sm:$0xf] }
  0xad   : > { %v1508_v27 = vpop.eup %1507 }
  0xae   : > { %v470_v28 = vmul.f32 %v1506_v21, %v469_v26  ;;  %v444_v29 = vmul.f32 %v1508_v27, %v442_v22  ;;  %vm450_vm5 = vweird.f32 %v1508_v27  ;;  %v757_v26 = vsel %vm641_vm9, %v584_v25, 0 }
  0xaf   : > { %vm451_vm7 = vmor %vm449_vm6, %vm450_vm5 }
  0xb0   : > { %v445_v31 = vmul.f32 %v1508_v27, %v444_v29  ;;  %v474_v32 = vsel %vm473_vm4, %v1506_v21, %v470_v28 }
  0xb1   : > { %v475_v33 = vmul.f32 %v474_v32, %v1782_v0 }
  0xb2   : > { %v446_v34 = vmul.f32 0.5, %v445_v31 }
  0xb3   : > { %v476_v35 = vmul.f32 %v1501_v30, %v475_v33 }
  0xb4   : > { %v447_v36 = vsub.f32 1.5, %v446_v34 }
  0xb5   : > { %v477_v37 = vpack.c.bf16 %v476_v35, %v476_v35 }
  0xb6   : > { %v448_v38 = vmul.f32 %v1508_v27, %v447_v36 }
  0xb7   : > { %1347 = vmatmul.msk.bf16.vlgmr.msra.gmra.mxu1 %vm430_vm0, %v477_v37  ;;  %1356 = vmatmul.msk.bf16.vlgmr.msra.gmra.mxu2 %vm430_vm0, %v477_v37 }
  0xb8   : > { %v452_v39 = vsel %vm451_vm7, %v1508_v27, %v448_v38 }
  0xb9   : > { %v453_v40 = vmul.f32 %v452_v39, %v1782_v0 }
  0xbb   : > { %v457_v41 = vmul.f32 %v1501_v30, %v453_v40 }
  0xbd   : > { %v458_v42 = vpack.c.bf16 %v457_v41, %v457_v41 }
  0xbf   : > { %1338 = vmatmul.msk.bf16.vlgmr.msra.gmra.mxu0 %vm430_vm0, %v458_v42 }
 0x134   : > { %v538_v43 = vpop.f32.mrf.mxu1 }
 0x135   : > { %v589_v44 = vpack.c.bf16 %v538_v43, %v538_v43 }
 0x137   : > { %663 = vrot.lane.b32.xlu2 %v589_v44, %s1630_s18  ;;  %774 = vrot.lane.b32.xlu0 %v589_v44, %s1631_s19  ;;  %v595_v45 = vsel %vm590_vm8, %v589_v44, 0 }
 0x138   : > { %604 = vmatpush.bf16.xpose.msra.mxu3 %v595_v45 }
 0x13a   : > { %v567_v46 = vpop.f32.mrf.mxu2 }
 0x13b   : > { %v1820_v47 = vpack.c.bf16 %v567_v46, %v567_v46 }
 0x13c   : > { %v506_v48 = vpop.f32.mrf.mxu0  ;;  %v540_v49 = vpop.f32.mrf.mxu1 }
 0x13d   : > { %v588_v50 = vpack.c.bf16 %v506_v48, %v506_v48  ;;  %v643_v51 = vsel %vm641_vm9, %v1820_v47, 0 }
 0x13e   : > { %652 = vmatpush.bf16.msrb.mxu0 %v643_v51 }
 0x13f   : > { %660 = vrot.lane.b32.xlu2 %v588_v50, %s1630_s18  ;;  %1357 = vmatmul.msk.bf16.vlgmr.msra.gmra.mxu3 %vm590_vm8, %v588_v50 }
 0x142   : > { %v569_v52 = vpop.f32.mrf.mxu2  ;;  %766 = vmatpush.bf16.msra.mxu0 %v757_v26 }
 0x144   : > { %v508_v53 = vpop.f32.mrf.mxu0 }
 0x147   : > { %866 = vrot.lane.b32.xlu2 %v589_v44, %s1632_s23 }
 0x14f   : > { %864 = vrot.lane.b32.xlu2 %v588_v50, %s1632_s23 }
 0x191   : > { %v664_v54 = vpop.permute.xlu2 %663 }
 0x192   : > { %v669_v55 = vsel %vm590_vm8, %v664_v54, 0 }
 0x193   : > { %678 = vmatpush.bf16.xpose.msrb.mxu1 %v669_v55 }
 0x199   : > { %v661_v56 = vpop.permute.xlu2 %660 }
 0x19a   : > { %1359 = vmatmul.msk.bf16.vlgmr.msrb.gmra.mxu1 %vm590_vm8, %v661_v56 }
 0x1a1   : > { %v867_v18 = vpop.permute.xlu2 %866 }
 0x1a2   : > { %v872_v40 = vsel %vm590_vm8, %v867_v18, 0 }
 0x1a9   : > { %v775_v57 = vpop.permute.xlu0 %774  ;;  %v1843_v19 = vpop.permute.xlu2 %864 }
 0x1aa   : > { %v780_v58 = vsel %vm590_vm8, %v775_v57, 0 }
 0x1ab   : > { %789 = vmatpush.bf16.xpose.msra.mxu1 %v780_v58 }
 0x1c2   : > { %v606_v63 = vpop.f32.mrf.mxu3 }
 0x1c3   : > { %v610_v3 = vmul.f32 0.35355338, %v606_v63 }
 0x1c5   : > { %v611_v4 = vadd.f32 %v610_v3, %v1835_v2 }
 0x1c7   : > { %v612_v5 = vsel %vm590_vm8, %v611_v4, -inf }
 0x1c8   : > { %613 = vmax.xlane.f32.xlu1 %v612_v5  ;;  %v585_v5 = vld [vmem:[%s1989_s6 + $0x4] sm:$0xf] }
 0x1ca   : > { %v608_v6 = vpop.f32.mrf.mxu3 }
 0x1cb   : > { %v738_v6 = vsel %vm641_vm9, %v585_v5, 0 }
 0x1cc   : > { %747 = vmatpush.bf16.msrb.mxu3 %v738_v6 }
 0x217   : > { %v680_v7 = vpop.f32.mrf.mxu1 }
 0x218   : > { %v684_v8 = vmul.f32 0.35355338, %v680_v7 }
 0x21a   : > { %v685_v9 = vadd.f32 %v684_v8, %v1835_v2 }
 0x21c   : > { %v686_v10 = vsel %vm590_vm8, %v685_v9, -inf }
 0x21d   : > { %687 = vmax.xlane.f32.xlu2 %v686_v10 }
 0x21f   : > { %v682_v11 = vpop.f32.mrf.mxu1 }
 0x23b   : > { %v614_v12 = vpop.xlane.xlu1 %613 }
 0x23c   : > { %v615_v13 = vsub.f32 %v611_v4, %v614_v12 }
 0x23e   : > { %v616_v15 = vmul.f32 1.442695, %v615_v13 }
 0x240   : > { %1509 = vpow2.f32 %v616_v15 }
 0x246   : > { %v1510_v16 = vpop.eup %1509 }
 0x247   : > { %v618_v17 = vsel %vm590_vm8, %v1510_v16, 0.0 }
 0x248   : > { %619 = vadd.xlane.f32.xlu1 %v618_v17 }
 0x261   : > { %772 = vrot.lane.b32.xlu1 %v588_v50, %s1631_s19 }
 0x290   : > { %v688_v20 = vpop.xlane.xlu2 %687 }
 0x291   : > { %v689_v21 = vsub.f32 %v685_v9, %v688_v20 }
 0x293   : > { %v690_v22 = vmul.f32 1.442695, %v689_v21 }
 0x295   : > { %1511 = vpow2.f32 %v690_v22 }
 0x29b   : > { %v1512_v23 = vpop.eup %1511 }
 0x29c   : > { %v692_v24 = vsel %vm590_vm8, %v1512_v23, 0.0 }
 0x29d   : > { %693 = vadd.xlane.f32.xlu2 %v692_v24 }
 0x2b5   : > { %712 = vrot.lane.b32.xlu2 %v1820_v47, %s1630_s18 }
 0x2bb   : > { %v620_v27 = vpop.xlane.xlu1 %619 }
 0x2bc   : > { %1513 = vrcp.f32 %v620_v27  ;;  %v632_v31 = vand.u32 2147483648, %v620_v27  ;;  %v630_v33 = vand.u32 2147483647, %v620_v27  ;;  %vm626_vm14 = vweird.f32 %v620_v27 }
 0x2be   : > { %v633_v35 = vor.u32 1.1754944e-38, %v632_v31  ;;  %vm631_vm1 = vcmp.eq.f32.partialorder %v630_v33, 8.507059e+37 }
 0x2c2   : > { %v1514_v28 = vpop.eup %1513 }
 0x2c3   : > { %v622_v29 = vmul.f32 %v1514_v28, %v620_v27  ;;  %vm627_vm13 = vweird.f32 %v1514_v28 }
 0x2c4   : > { %vm628_vm15 = vmor %vm626_vm14, %vm627_vm13 }
 0x2c5   : > { %v623_v30 = vsub.f32 1.0, %v622_v29 }
 0x2c7   : > { %v624_v32 = vmul.f32 %v1514_v28, %v623_v30 }
 0x2c9   : > { %v625_v34 = vadd.f32 %v1514_v28, %v624_v32 }
 0x2cb   : > { %v629_v36 = vsel %vm628_vm15, %v1514_v28, %v625_v34 }
 0x2cc   : > { %v634_v37 = vsel %vm631_vm1, %v633_v35, %v629_v36 }
 0x2cd   : > { %v635_v38 = vmul.f32 %v1510_v16, %v634_v37 }
 0x2cf   : > { %v636_v39 = vpack.c.bf16 %v635_v38, %v635_v38 }
 0x2d1   : > { %1358 = vmatmul.msk.bf16.vlgmr.msrb.gmra.mxu0 %vm590_vm8, %v636_v39 }
 0x2d2   : > { %881 = vmatpush.bf16.xpose.msrb.mxu0 %v872_v40 }
 0x2d3   : > { %v773_v41 = vpop.permute.xlu1 %772 }
 0x2d4   : > { %1363 = vmatmul.msk.bf16.vlgmr.msra.gmra.mxu1 %vm590_vm8, %v773_v41 }
 0x310   : > { %v694_v42 = vpop.xlane.xlu2 %693 }
 0x311   : > { %1515 = vrcp.f32 %v694_v42  ;;  %v706_v49 = vand.u32 2147483648, %v694_v42  ;;  %v704_v51 = vand.u32 2147483647, %v694_v42  ;;  %vm700_vm3 = vweird.f32 %v694_v42 }
 0x313   : > { %v707_v53 = vor.u32 1.1754944e-38, %v706_v49  ;;  %vm705_vm5 = vcmp.eq.f32.partialorder %v704_v51, 8.507059e+37 }
 0x317   : > { %v1516_v43 = vpop.eup %1515 }
 0x318   : > { %v696_v44 = vmul.f32 %v1516_v43, %v694_v42  ;;  %v713_v45 = vpop.permute.xlu2 %712  ;;  %vm701_vm2 = vweird.f32 %v1516_v43 }
 0x319   : > { %v718_v46 = vsel %vm641_vm9, %v713_v45, 0  ;;  %vm702_vm4 = vmor %vm700_vm3, %vm701_vm2  ;;  %vm1083_vm2 = vcmask 257024   ;;  %vm1012_vm3 = vcmask 31744  }
 0x31a   : > { %v697_v48 = vsub.f32 1.0, %v696_v44  ;;  %727 = vmatpush.bf16.msrb.mxu2 %v718_v46  ;;  %v586_v44 = vld [vmem:[%s1989_s6 + $0x8] sm:$0xf] }
 0x31b   : > { %v848_v45 = vsel %vm641_vm9, %v586_v44, 0 }
 0x31c   : > { %v698_v50 = vmul.f32 %v1516_v43, %v697_v48  ;;  %857 = vmatpush.bf16.msra.mxu3 %v848_v45 }
 0x31e   : > { %v699_v52 = vadd.f32 %v1516_v43, %v698_v50 }
 0x320   : > { %v703_v54 = vsel %vm702_vm4, %v1516_v43, %v699_v52 }
 0x321   : > { %v708_v55 = vsel %vm705_vm5, %v707_v53, %v703_v54 }
 0x322   : > { %v709_v56 = vmul.f32 %v1512_v23, %v708_v55 }
 0x324   : > { %v710_v57 = vpack.c.bf16 %v709_v56, %v709_v56 }
 0x326   : > { %1360 = vmatmul.msk.bf16.vlgmr.msrb.gmra.mxu2 %vm590_vm8, %v710_v57 }
 0x34e   : > { %v654_v58 = vpop.f32.mrf.mxu0 }
 0x34f   : > { %v658_v59 = vpack.c.bf16 %v654_v58, %v654_v58 }
 0x351   : > { %1362 = vmatmul.msk.bf16.vlgmr.msra.gmra.mxu0 %vm590_vm8, %v658_v59  ;;  %v791_v60 = vpop.f32.mrf.mxu1 }
 0x352   : > { %v795_v62 = vmul.f32 0.35355338, %v791_v60 }
 0x354   : > { %v796_v63 = vadd.f32 %v795_v62, %v1835_v2 }
 0x356   : > { %v656_v1 = vpop.f32.mrf.mxu0  ;;  %v797_v3 = vsel %vm590_vm8, %v796_v63, -inf }
 0x357   : > { %798 = vmax.xlane.f32.xlu0 %v797_v3  ;;  %v587_v3 = vld [vmem:[%s1989_s6 + $0xc] sm:$0xf] }
 0x359   : > { %v793_v4 = vpop.f32.mrf.mxu1 }
 0x35a   : > { %v940_v4 = vsel %vm641_vm9, %v587_v3, 0 }
 0x361   : > { %1366 = vmatmul.msk.bf16.vlgmr.msrb.gmra.mxu0 %vm590_vm8, %v1843_v19 }
 0x3a9   : > { %v729_v7 = vpop.f32.mrf.mxu2 }
 0x3aa   : > { %v733_v8 = vpack.c.bf16 %v729_v7, %v729_v7 }
 0x3ac   : > { %1361 = vmatmul.msk.bf16.vlgmr.msrb.gmra.mxu3 %vm590_vm8, %v733_v8 }
 0x3b1   : > { %v731_v9 = vpop.f32.mrf.mxu2 }
 0x3ca   : > { %v799_v10 = vpop.xlane.xlu0 %798 }
 0x3cb   : > { %v800_v11 = vsub.f32 %v796_v63, %v799_v10 }
 0x3cd   : > { %v801_v12 = vmul.f32 1.442695, %v800_v11 }
 0x3ce   : > { %v1867_v13 = vpop.f32.mrf.mxu0 }
 0x3cf   : > { %1517 = vpow2.f32 %v801_v12 }
 0x3d5   : > { %v1518_v15 = vpop.eup %1517 }
 0x3d6   : > { %v770_v16 = vpop.f32.mrf.mxu0  ;;  %v803_v17 = vsel %vm590_vm8, %v1518_v15, 0.0 }
 0x3d7   : > { %804 = vadd.xlane.f32.xlu0 %v803_v17 }
 0x3de   : > { %v883_v18 = vpop.f32.mrf.mxu0 }
 0x3df   : > { %v887_v19 = vmul.f32 0.35355338, %v883_v18 }
 0x3e1   : > { %v888_v20 = vadd.f32 %v887_v19, %v1835_v2 }
 0x3e3   : > { %v889_v21 = vsel %vm590_vm8, %v888_v20, -inf }
 0x3e4   : > { %890 = vmax.xlane.f32.xlu1 %v889_v21 }
 0x3e6   : > { %v885_v22 = vpop.f32.mrf.mxu0 }
 0x3eb   : > { %822 = vrot.lane.b32.xlu0 %v1820_v47, %s1631_s19 }
 0x42f   : > { %v1874_v23 = vpop.f32.mrf.mxu3 }
 0x430   : > { %v769_v5 = vadd.f32 %v1867_v13, %v1874_v23  ;;  %v1418_v13 = vld [vmem:[%s1990_s7 + $0x8] sm:$0xff] }
 0x431   : > { %1005 = vmatpush.bf16.msrb.mxu3 %v1418_v13 }
 0x437   : > { %v751_v24 = vpop.f32.mrf.mxu3 }
 0x44a   : > { %v805_v25 = vpop.xlane.xlu0 %804 }
 0x44b   : > { %1519 = vrcp.f32 %v805_v25  ;;  %v817_v29 = vand.u32 2147483648, %v805_v25  ;;  %v815_v31 = vand.u32 2147483647, %v805_v25  ;;  %vm811_vm7 = vweird.f32 %v805_v25 }
 0x44d   : > { %v818_v34 = vor.u32 1.1754944e-38, %v817_v29  ;;  %vm816_vm11 = vcmp.eq.f32.partialorder %v815_v31, 8.507059e+37  ;;  %v1502_v29 = vld [vmem:[%s1985_s2] ss:$0 sm:$0xff] }
 0x451   : > { %v1520_v26 = vpop.eup %1519 }
 0x452   : > { %v807_v27 = vmul.f32 %v1520_v26, %v805_v25  ;;  %vm812_vm6 = vweird.f32 %v1520_v26 }
 0x453   : > { %vm813_vm10 = vmor %vm811_vm7, %vm812_vm6 }
 0x454   : > { %v808_v28 = vsub.f32 1.0, %v807_v27 }
 0x456   : > { %v809_v30 = vmul.f32 %v1520_v26, %v808_v28 }
 0x457   : > { %v891_v2 = vpop.xlane.xlu1 %890 }
 0x458   : > { %v810_v32 = vadd.f32 %v1520_v26, %v809_v30  ;;  %v892_v33 = vsub.f32 %v888_v20, %v891_v2  ;;  %v1417_v20 = vld [vmem:[%s1990_s7] sm:$0xff] }
 0x459   : > { %1006 = vmatpush.bf16.msrb.mxu3 %v1417_v20 }
 0x45a   : > { %v814_v35 = vsel %vm813_vm10, %v1520_v26, %v810_v32  ;;  %v893_v36 = vmul.f32 1.442695, %v892_v33 }
 0x45b   : > { %v819_v37 = vsel %vm816_vm11, %v818_v34, %v814_v35 }
 0x45c   : > { %v820_v38 = vmul.f32 %v1518_v15, %v819_v37  ;;  %1521 = vpow2.f32 %v893_v36 }
 0x45d   : > { %v823_v39 = vpop.permute.xlu0 %822 }
 0x45e   : > { %v828_v40 = vsel %vm641_vm9, %v823_v39, 0  ;;  %v821_v41 = vpack.c.bf16 %v820_v38, %v820_v38 }
 0x45f   : > { %837 = vmatpush.bf16.msra.mxu2 %v828_v40 }
 0x462   : > { %v1522_v42 = vpop.eup %1521  ;;  %1364 = vmatmul.msk.bf16.vlgmr.msra.gmra.mxu2 %vm590_vm8, %v821_v41 }
 0x463   : > { %v895_v43 = vsel %vm590_vm8, %v1522_v42, 0.0  ;;  %949 = vmatpush.bf16.msrb.mxu2 %v940_v4 }
 0x464   : > { %896 = vadd.xlane.f32.xlu1 %v895_v43 }
 0x47d   : > { %914 = vrot.lane.b32.xlu1 %v1820_v47, %s1632_s23 }
 0x4d7   : > { %v897_v46 = vpop.xlane.xlu1 %896 }
 0x4d8   : > { %1523 = vrcp.f32 %v897_v46  ;;  %v909_v53 = vand.u32 2147483648, %v897_v46  ;;  %vm903_vm13 = vweird.f32 %v897_v46  ;;  %v907_v55 = vand.u32 2147483647, %v897_v46 }
 0x4da   : > { %v910_v57 = vor.u32 1.1754944e-38, %v909_v53  ;;  %vm908_vm15 = vcmp.eq.f32.partialorder %v907_v55, 8.507059e+37 }
 0x4de   : > { %v1524_v48 = vpop.eup %1523 }
 0x4df   : > { %v899_v49 = vmul.f32 %v1524_v48, %v897_v46  ;;  %vm904_vm12 = vweird.f32 %v1524_v48 }
 0x4e0   : > { %vm905_vm14 = vmor %vm903_vm13, %vm904_vm12 }
 0x4e1   : > { %v900_v50 = vsub.f32 1.0, %v899_v49 }
 0x4e3   : > { %v901_v51 = vmul.f32 %v1524_v48, %v900_v50 }
 0x4e5   : > { %v902_v52 = vadd.f32 %v1524_v48, %v901_v51  ;;  %v839_v54 = vpop.f32.mrf.mxu2 }
 0x4e6   : > { %v843_v47 = vpack.c.bf16 %v839_v54, %v839_v54 }
 0x4e7   : > { %v906_v56 = vsel %vm905_vm14, %v1524_v48, %v902_v52 }
 0x4e8   : > { %1365 = vmatmul.msk.bf16.vlgmr.msra.gmra.mxu3 %vm590_vm8, %v843_v47  ;;  %v911_v58 = vsel %vm908_vm15, %v910_v57, %v906_v56 }
 0x4e9   : > { %v912_v60 = vmul.f32 %v1522_v42, %v911_v58 }
 0x4eb   : > { %v913_v1 = vpack.c.bf16 %v912_v60, %v912_v60 }
 0x4ed   : > { %v841_v59 = vpop.f32.mrf.mxu2 }
 0x4ef   : > { %v915_v62 = vpop.permute.xlu1 %914 }
 0x4f0   : > { %v920_v63 = vsel %vm641_vm9, %v915_v62, 0 }
 0x4f1   : > { %929 = vmatpush.bf16.msrb.mxu1 %v920_v63 }
 0x4f4   : > { %1367 = vmatmul.msk.bf16.vlgmr.msrb.gmra.mxu1 %vm590_vm8, %v913_v1 }
 0x56b   : > { %v859_v6 = vpop.f32.mrf.mxu3 }
 0x56c   : > { %v863_v7 = vadd.f32 %v859_v6, %v769_v5 }
 0x571   : > { %v931_v8 = vpop.f32.mrf.mxu1 }
 0x572   : > { %v935_v9 = vpack.c.bf16 %v931_v8, %v931_v8 }
 0x573   : > { %v861_v10 = vpop.f32.mrf.mxu3 }
 0x574   : > { %1368 = vmatmul.msk.bf16.vlgmr.msrb.gmra.mxu2 %vm590_vm8, %v935_v9 }
 0x579   : > { %v933_v11 = vpop.f32.mrf.mxu1 }
 0x5f7   : > { %v951_v12 = vpop.f32.mrf.mxu2 }
 0x5f8   : > { %v955_v15 = vadd.f32 %v951_v12, %v863_v7 }
 0x5fa   : > { %v956_v16 = vadd.f32 %v955_v15, %v1782_v0 }
 0x5fc   : > { %1086 = vst.msk [vmem:[#allocation4] sm:$0xff] %vm430_vm0, %v956_v16  ;;  %v958_v17 = vmul.f32 %v956_v16, %v956_v16 }
 0x5fe   : > { %v959_v18 = vsel %vm430_vm0, %v958_v17, 0.0 }
 0x5ff   : > { %960 = vadd.xlane.f32.xlu2 %v959_v18  ;;  %v953_v19 = vpop.f32.mrf.mxu2 }
 0x672   : > { %v961_v21 = vpop.xlane.xlu2 %960 }
 0x673   : > { %v962_v0 = vmul.f32 %v961_v21, %v1802_v14 }
 0x675   : > { %v963_v22 = vadd.f32 1e-06, %v962_v0 }
 0x677   : > { %1525 = vrsqrt.f32 %v963_v22  ;;  %vm970_vm9 = vweird.f32 %v963_v22 }
 0x67d   : > { %v1526_v23 = vpop.eup %1525 }
 0x67e   : > { %v965_v24 = vmul.f32 %v1526_v23, %v963_v22  ;;  %vm971_vm8 = vweird.f32 %v1526_v23 }
 0x67f   : > { %vm972_vm1 = vmor %vm970_vm9, %vm971_vm8 }
 0x680   : > { %v966_v25 = vmul.f32 %v1526_v23, %v965_v24 }
 0x682   : > { %v967_v26 = vmul.f32 0.5, %v966_v25 }
 0x684   : > { %v968_v27 = vsub.f32 1.5, %v967_v26 }
 0x686   : > { %v969_v28 = vmul.f32 %v1526_v23, %v968_v27 }
 0x688   : > { %v973_v30 = vsel %vm972_vm1, %v1526_v23, %v969_v28 }
 0x689   : > { %v974_v31 = vmul.f32 %v973_v30, %v956_v16 }
 0x68b   : > { %v978_v2 = vmul.f32 %v1502_v29, %v974_v31 }
 0x68d   : > { %v979_v14 = vpack.c.bf16 %v978_v2, %v978_v2 }
 0x68f   : > { %1377 = vmatmul.msk.bf16.vlgmr.msrb.gmra.mxu3 %vm430_vm0, %v979_v14  ;;  %1084 = vst.msk [vmem:[#allocation2] sm:$0xf] %vm1083_vm2, %v979_v14 }
 0x712   : > { %v1008_v32 = vpop.f32.mrf.mxu3 }
 0x713   : > { %v1013_v33 = vsel %vm1012_vm3, %v1008_v32, -inf }
 0x714   : > { %1014 = vmax.xlane.f32.xlu0 %v1013_v33 }
 0x71a   : > { %v1010_v34 = vpop.f32.mrf.mxu3 }
 0x787   : > { %v1015_v35 = vpop.xlane.xlu0 %1014 }
 0x788   : > { %vm1016_vm4 = vcmp.ge.f32.partialorder %v1008_v32, %v1015_v35 }
 0x789   : > { %v1017_v36 = vsel %vm1016_vm4, %v1831_v61, 4 }
 0x78a   : > { %v1018_v37 = vsel %vm1012_vm3, %v1017_v36, 2147483647 }
 0x78b   : > { %v1020_v38 = vshra.s32 %v1018_v37, 16  ;;  %v1019_v40 = vand.u32 65535, %v1018_v37 }
 0x78d   : > { %v1022_v39 = vcvt.s32.f32 %v1020_v38  ;;  %v1021_v42 = vcvt.s32.f32 %v1019_v40 }
 0x78f   : > { %1023 = vmin.xlane.f32.xlu1 %v1022_v39 }
 0x802   : > { %v1024_v41 = vpop.xlane.xlu1 %1023 }
 0x803   : > { %vm1025_vm0 = vcmp.eq.f32.partialorder %v1022_v39, %v1024_v41  ;;  %v1030_v44 = vcvt.f32.s32 %v1024_v41 }
 0x804   : > { %v1026_v43 = vsel %vm1025_vm0, %v1021_v42, inf }
 0x805   : > { %1027 = vmin.xlane.f32.xlu2 %v1026_v43  ;;  %v1031_v46 = vshll.u32 %v1030_v44, 16 }
 0x878   : > { %v1028_v45 = vpop.xlane.xlu2 %1027 }
 0x879   : > { %v1029_v48 = vcvt.f32.s32 %v1028_v45 }
 0x87b   : > { %v1032_v49 = vadd.s32 %v1031_v46, %v1029_v48 }
 0x87d   : > { %vm1033_vm5 = vcmp.eq.s32.totalorder %v1831_v61, %v1032_v49 }
 0x87e   : > { %v1034_v50 = vsel %vm1033_vm5, -1e+30, %v1008_v32 }
 0x87f   : > { %v1035_v51 = vsel %vm1012_vm3, %v1034_v50, -inf }
 0x880   : > { %1036 = vmax.xlane.f32.xlu0 %v1035_v51 }
 0x8f3   : > { %v1037_v52 = vpop.xlane.xlu0 %1036 }
 0x8f4   : > { %vm1038_vm6 = vcmp.ge.f32.partialorder %v1034_v50, %v1037_v52 }
 0x8f5   : > { %v1039_v53 = vsel %vm1038_vm6, %v1831_v61, 4 }
 0x8f6   : > { %v1040_v54 = vsel %vm1012_vm3, %v1039_v53, 2147483647 }
 0x8f7   : > { %v1042_v55 = vshra.s32 %v1040_v54, 16  ;;  %v1041_v56 = vand.u32 65535, %v1040_v54 }
 0x8f9   : > { %v1044_v47 = vcvt.s32.f32 %v1042_v55  ;;  %v1043_v58 = vcvt.s32.f32 %v1041_v56 }
 0x8fb   : > { %1045 = vmin.xlane.f32.xlu2 %v1044_v47 }
 0x96e   : > { %v1046_v57 = vpop.xlane.xlu2 %1045 }
 0x96f   : > { %vm1047_vm7 = vcmp.eq.f32.partialorder %v1044_v47, %v1046_v57  ;;  %v1052_v60 = vcvt.f32.s32 %v1046_v57 }
 0x970   : > { %v1048_v59 = vsel %vm1047_vm7, %v1043_v58, inf }
 0x971   : > { %1049 = vmin.xlane.f32.xlu0 %v1048_v59  ;;  %v1053_v63 = vshll.u32 %v1052_v60, 16 }
 0x9e4   : > { %v1050_v62 = vpop.xlane.xlu0 %1049 }
 0x9e5   : > { %v1051_v1 = vcvt.f32.s32 %v1050_v62 }
 0x9e7   : > { %v1054_v3 = vadd.s32 %v1053_v63, %v1051_v1 }
 0x9e9   : > { %vm1055_vm10 = vcmp.eq.s32.totalorder %v1831_v61, %v1054_v3 }
 0x9ea   : > { %vm1056_vm11 = vmor %vm1033_vm5, %vm1055_vm10 }
 0x9eb   : > { %v1057_v4 = vsel %vm1056_vm11, %v1008_v32, -1e+30 }
 0x9ec   : > { %v1058_v5 = vsel %vm1012_vm3, %v1057_v4, -inf }
 0x9ed   : > { %1059 = vmax.xlane.f32.xlu1 %v1058_v5 }
 0xa60   : > { %v1060_v6 = vpop.xlane.xlu1 %1059 }
 0xa61   : > { %v1061_v7 = vsub.f32 %v1057_v4, %v1060_v6 }
 0xa63   : > { %v1062_v8 = vmul.f32 1.442695, %v1061_v7 }
 0xa65   : > { %1527 = vpow2.f32 %v1062_v8 }
 0xa6b   : > { %v1528_v9 = vpop.eup %1527 }
 0xa6c   : > { %v1064_v10 = vsel %vm1056_vm11, %v1528_v9, 0.0 }
 0xa6d   : > { %v1065_v11 = vsel %vm1012_vm3, %v1064_v10, 0.0 }
 0xa6e   : > { %1066 = vadd.xlane.f32.xlu2 %v1065_v11 }
 0xae1   : > { %v1067_v12 = vpop.xlane.xlu2 %1066 }
 0xae2   : > { %1529 = vrcp.f32 %v1067_v12  ;;  %v1079_v61 = vand.u32 2147483648, %v1067_v12  ;;  %v1077_v19 = vand.u32 2147483647, %v1067_v12  ;;  %vm1073_vm13 = vweird.f32 %v1067_v12 }
 0xae4   : > { %v1080_v20 = vor.u32 1.1754944e-38, %v1079_v61  ;;  %vm1078_vm15 = vcmp.eq.f32.partialorder %v1077_v19, 8.507059e+37 }
 0xae8   : > { %v1530_v15 = vpop.eup %1529 }
 0xae9   : > { %v1069_v16 = vmul.f32 %v1530_v15, %v1067_v12  ;;  %vm1074_vm12 = vweird.f32 %v1530_v15 }
 0xaea   : > { %vm1075_vm14 = vmor %vm1073_vm13, %vm1074_vm12 }
 0xaeb   : > { %v1070_v17 = vsub.f32 1.0, %v1069_v16 }
 0xaed   : > { %v1071_v18 = vmul.f32 %v1530_v15, %v1070_v17 }
 0xaef   : > { %v1072_v13 = vadd.f32 %v1530_v15, %v1071_v18 }
 0xaf1   : > { %v1076_v21 = vsel %vm1075_vm14, %v1530_v15, %v1072_v13 }
 0xaf2   : > { %v1081_v0 = vsel %vm1078_vm15, %v1080_v20, %v1076_v21 }
 0xaf3   : > { %v1082_v22 = vmul.f32 %v1081_v0, %v1064_v10 }
 0xaf5   : > { %1085 = vst.msk [vmem:[#allocation3] sm:$0xff] %vm1012_vm3, %v1082_v22 }
 0xaf6 PF: > { %v1420_v23 = vld [vmem:[%s1773_s29 + $0x8] sm:$0xff]  ;;  %v1419_v24 = vld [vmem:[%s1773_s29] sm:$0xff]  ;;  %vm1104_vm8 = vcmask 261120   ;;  %v1424_v26 = vld [vmem:[%s1778_s30 + $0x18] sm:$0xff]  ;;  %v1180_v30 = vlaneseq  ;;  %v1182_v31 = vstv %s1611_s16  ;;  %vm1186_vm9 = vcmask 31744   ;;  %p1404_p1 = scmp.ne.s32.totalorder %s1611_s16, 3 }
 0xaf7   : > { %1114 = vmatpush.bf16.msra.mxu0 %v1420_v23  ;;  %v1087_v25 = vld [vmem:[#allocation2] sm:$0xf]  ;;  %1171 = vmatpush.bf16.msra.mxu1 %v1424_v26  ;;  %v1423_v27 = vld [vmem:[%s1778_s30 + $0x10] sm:$0xff]  ;;  %v1422_v28 = vld [vmem:[%s1778_s30 + $0x8] sm:$0xff]  ;;  %vm1163_vm2 = vcmask 523264  }
 0xaf8   : > { %v1421_v29 = vld [vmem:[%s1778_s30] sm:$0xff]  ;;  %v1181_v2 = vand.u32 127, %v1180_v30  ;;  %v1190_v49 = vld [vmem:[#allocation4] sm:$0xff] }
 0xafa   : > { %vm1183_vm1 = vcmp.eq.s32.totalorder %v1181_v2, %v1182_v31 }
 0xafb   : > { %1115 = vmatpush.bf16.msra.mxu0 %v1419_v24  ;;  %1172 = vmatpush.bf16.msra.mxu1 %v1423_v27 }
 0xafc   : > { %v1184_v14 = vld [vmem:[#allocation3] sm:$0xff] }
 0xafd   : > { %v1185_v32 = vsel %vm1183_vm1, %v1184_v14, 0.0 }
 0xafe   : > { %1386 = vmatmul.msk.bf16.vlgmr.msra.gmra.mxu0 %vm1104_vm8, %v1087_v25  ;;  %v1187_v34 = vsel %vm1186_vm9, %v1185_v32, 0.0 }
 0xaff   : > { %1173 = vmatpush.bf16.msra.mxu1 %v1422_v28  ;;  %1188 = vadd.xlane.f32.xlu0 %v1187_v34 }
 0xb03   : > { %1174 = vmatpush.bf16.msra.mxu1 %v1421_v29 }
 0xb72   : > { %v1189_v46 = vpop.xlane.xlu0 %1188 }
 0xb7b   : > { %v1117_v33 = vpop.f32.mrf.mxu0 }
 0xb7c   : > { %v1121_v35 = vmul.f32 %v1117_v33, %v1117_v33 }
 0xb7e   : > { %v1122_v36 = vmul.f32 %v1121_v35, %v1117_v33 }
 0xb80   : > { %v1123_v37 = vmul.f32 0.044715, %v1122_v36 }
 0xb82   : > { %v1124_v38 = vadd.f32 %v1123_v37, %v1117_v33 }
 0xb83   : > { %v1119_v39 = vpop.f32.mrf.mxu0 }
 0xb84   : > { %v1125_v40 = vmul.f32 0.7978846, %v1124_v38 }
 0xb86   : > { %1531 = vtanh.f32 %v1125_v40 }
 0xb8c   : > { %v1532_v41 = vpop.eup %1531 }
 0xb8d   : > { %v1127_v42 = vadd.f32 1.0, %v1532_v41 }
 0xb8f   : > { %v1128_v43 = vmul.f32 0.5, %v1127_v42 }
 0xb91   : > { %v1129_v44 = vmul.f32 %v1128_v43, %v1117_v33 }
 0xb93   : > { %v1130_v45 = vpack.c.bf16 %v1129_v44, %v1129_v44 }
 0xb95   : > { %1403 = vmatmul.msk.bf16.vlgmr.msra.gmra.mxu1 %vm1163_vm2, %v1130_v45 }
 0xc12   : > { %v1176_v48 = vpop.f32.mrf.mxu1 }
 0xc13   : > { %v1191_v50 = vmul.f32 %v1189_v46, %v1176_v48 }
 0xc15   : > { %v1192_v51 = vadd.f32 %v1191_v50, %v1190_v49 }
 0xc16   : > { %1197 = sbr.rel (%p1404_p1) target bundleno = 3104 (0xc20), region = 68 }
 0xc17   : > { %1193 = vst.msk [vmem:[#allocation4] sm:$0xff] %vm1104_vm8, %v1192_v51 }
 0xc1a   : > { %v1178_v52 = vpop.f32.mrf.mxu1 }
 0xc1e   : > { %v1198_v53 = vld [vmem:[#allocation4] sm:$0xff] }
 0xc1f   : > { %1199 = vst.msk [vmem:[%s401_s20] sm:$0xff] %vm1104_vm8, %v1198_v53 }
 0xc20 PF: > { %s1406_s29 = sshll.u32 %s1615_s17, 3  ;;  %s1214_s22 = sshll.u32 %s401_s20, 4  ;;  %s1215_s22 = int_to_ptr.vmem [resolvable:$true] %s1214_s22 }
 0xc21   : > { %s1212_s21 = scalar_lea.hbm %s1993_s10, %s1406_s29  ;;  %s2014_s27 = sand.u32 1, %s1603_s14  }
 0xc22   : > { %s1216_s16 = sshll.u32 %s1212_s21, 4  ;;  %s1201_s28 = scalar_lea.sflag [#allocation6], %s2014_s27  ;;  %s1217_s16 = int_to_ptr.hbm [resolvable:$true] %s1216_s16 }
 0xc23   : > { %s1547_s13 = sshra.s32 %s1217_s16, 4  ;;  %s1553_s19 = scalar_lea.hbm %s1993_s10, 16  ;;  %s1548_s13 = int_to_ptr.hbm [resolvable:$true] %s1547_s13 }
 0xc24   : > { %s1549_s15 = scalar_lea.hbm %s1548_s13, 8  ;;  %p1554_p6 = scmp.lt.s32.totalorder %s1548_s13, %s1993_s10 }
 0xc25   : > { %p1550_p2 = scmp.ne.s32.totalorder %s1548_s13, %s1549_s15  ;;  %p1555_p7 = scmp.lt.s32.totalorder %s1553_s19, %s1549_s15 }
 0xc27   : > { %p1551_p4 = pnand %p1550_p2, %p1738_p3  ;;  %p1556_p8 = por %p1555_p7, %p1554_p6 }
 0xc29   : > { %p1552_p5 = pneg %p1551_p4 }
 0xc2b   : > { %p1557_p10 = pnand %p1556_p8, %p1552_p5 }
 0xc2d   : > { %1560 = shalt.err (!%p1557_p10)
}
 0xc2e   : > { %1425 = dma.vmem_to_hbm [thread:$0]  (%p1738_p3), %s1215_s22, 128, %s1217_s16, %s1201_s28  }
 0xc2f PF: > { %s2015_s20 = sld [smem:[#allocation12_spill]] }
 0xc30   : > { %s2016_s11 = sld [smem:[#allocation8_spill]] }
 0xc35   : > { %p1431_p11 = scmp.ge.s32.totalorder %s2015_s20, 2 }
 0xc36   : > { %s1228_s29 = sand.u32 1, %s2016_s11  }
 0xc37   : > { %p1428_p12 = pnand %p1431_p11, %p1748_p9  ;;  %s1229_s30 = scalar_lea.sflag [#allocation6], %s1228_s29 }
 0xc39   : > { %p1429_p13 = pneg %p1428_p12 }
 0xc3b   : > { %1594 = dma.done.wait (%p1429_p13), %s1229_s30, 128  }
 0xc3c   : > { %1596 = vsyncadd (%p1429_p13), %s1229_s30, 4294967168  ;;  %s23_s20 = sadd.s32 1, %s2015_s20   ;;  %s2018_s12 = sld [smem:[#allocation9_spill]] }
 0xc3d   : > { %p20_p0 = scmp.ge.s32.totalorder %s23_s20, 10   ;;  %s2019_s15 = sld [smem:[#allocation16_spill]] }
 0xc3e   : > { %s2020_s16 = sld [smem:[#allocation10_spill]]  ;;  %s2024_s13 = smov %s1603_s14 }
 0xc3f   : > { %s2021_s17 = sld [smem:[#allocation11_spill]]  ;;  %22 = sbr.rel (!%p20_p0) target bundleno = 5 (0x5), region = 111 }
 0xc40   : > { %s2022_s18 = sld [smem:[#allocation13_spill]] }
 0xc41   : > { %s2023_s19 = sld [smem:[#allocation14_spill]] }
 0xc42   : > { %s2025_s14 = smov %s2018_s12 }
 0xc44   :  { %1235 = vsyncpa [#allocation6], 1 }
 0xc45   :  { %1237 = vsyncpa [#allocation6 + $0x1], 1 }

</bundles_post_ra>
